<compile_context>
chip_gen: v6e
topology: v6e:2x2x1
jax: 0.10.0
libtpu: 0.0.40
codegen_flags: <defaults>
</compile_context>

<pallas_src>
import jax
import jax.numpy as jnp
from jax import lax
from jax.experimental import pallas as pl
from jax.experimental.pallas import tpu as pltpu


def encoder_kernel(emb_ref, wihf_ref, wihb_ref, bif_ref, bib_ref,
                   whh_ref, bhhn_ref, wfc_ref, bfc_ref, out_ref, hid_ref):
    S, Bt, E = emb_ref.shape            # emb block: [S, bt, E] (matmul dtype)
    H3 = wihf_ref.shape[1]              # 3H
    H = H3 // 3
    H2 = 2 * H
    mdtype = whh_ref.dtype              # bf16 (perf) or f32 (exact)

    # Hoist weight loads / bias broadcasts out of the recurrence (JAX does not
    # CSE broadcast_in_dim inside the unrolled loop).
    whh = whh_ref[...]                                        # [2H, 6H] block-diag
    bhn_f = jnp.broadcast_to(bhhn_ref[:, 0:H], (Bt, H))       # n-gate b_hh (fwd)
    bhn_b = jnp.broadcast_to(bhhn_ref[:, H:H2], (Bt, H))      # n-gate b_hh (bwd)

    # ---- input projection: two dense matmuls, all steps, both directions ----
    # (emb read once; b_ih and the r/z-gate b_hh are pre-folded into bif/bib)
    x2 = emb_ref[...].reshape(S * Bt, E)
    gi_f = (jnp.dot(x2, wihf_ref[...], preferred_element_type=jnp.float32)
            + bif_ref[...]).reshape(S, Bt, H3)                # [S, bt, 3H] f32
    gi_b = (jnp.dot(x2, wihb_ref[...], preferred_element_type=jnp.float32)
            + bib_ref[...]).reshape(S, Bt, H3)                # [S, bt, 3H] f32

    # ---- fused bidirectional recurrence (fully unrolled, S small/static) ----
    # One MXU push per step: h_cat = [h_f | h_b] @ block-diag W_hh -> [bt, 6H]
    # with direction-blocked columns [r_f z_f n_f | r_b z_b n_b].
    h_f = jnp.zeros((Bt, H), jnp.float32)
    h_b = jnp.zeros((Bt, H), jnp.float32)
    hf_steps, hb_steps = [], []
    for i in range(S):
        h_cat = jnp.concatenate([h_f, h_b], axis=-1).astype(mdtype)
        gh = jnp.dot(h_cat, whh, preferred_element_type=jnp.float32)  # [bt, 6H]
        gf = gi_f[i]                       # fwd input proj at time i
        gb = gi_b[S - 1 - i]               # bwd input proj at time S-1-i

        # forward direction (gate math in f32)
        r_f = jax.nn.sigmoid(gf[:, 0:H] + gh[:, 0:H])
        z_f = jax.nn.sigmoid(gf[:, H:2 * H] + gh[:, H:2 * H])
        n_f = jnp.tanh(gf[:, 2 * H:H3] + r_f * (gh[:, 2 * H:H3] + bhn_f))
        h_f = (1.0 - z_f) * n_f + z_f * h_f

        # backward direction
        r_b = jax.nn.sigmoid(gb[:, 0:H] + gh[:, H3:H3 + H])
        z_b = jax.nn.sigmoid(gb[:, H:2 * H] + gh[:, H3 + H:H3 + 2 * H])
        n_b = jnp.tanh(gb[:, 2 * H:H3] + r_b * (gh[:, H3 + 2 * H:2 * H3] + bhn_b))
        h_b = (1.0 - z_b) * n_b + z_b * h_b

        hf_steps.append(h_f)
        hb_steps.append(h_b)

    # ---- single dense full-block output store (no per-step masked stores) ----
    # out[t, :, 0:H]  = fwd state after step t
    # out[t, :, H:2H] = bwd state produced at step S-1-t (time-reversed pairing)
    out_ref[...] = jnp.concatenate(
        [jnp.stack(hf_steps, axis=0), jnp.stack(hb_steps[::-1], axis=0)],
        axis=-1)

    # hidden = tanh(fc(cat(h_fwd_final, h_bwd_final)))
    h_last = jnp.concatenate([h_f, h_b], axis=-1).astype(mdtype)
    hid_ref[...] = jnp.tanh(
        jnp.dot(h_last, wfc_ref[...], preferred_element_type=jnp.float32)
        + bfc_ref[...])


def encoder_forward(src, params, matmul_dtype=jnp.bfloat16, bt=None):
    """src: [S, B] int32. Returns (outputs [S,B,2H] f32, hidden [B,D] f32)."""
    emb = params["embedding"][src].astype(jnp.float32)   # embedding gather = glue
    # dropout: eval-mode identity
    S, B, E = emb.shape
    H = params["w_hh_f"].shape[1]
    D = params["w_fc"].shape[0]
    H2, H3, H6 = 2 * H, 3 * H, 6 * H

    f32 = lambda a: jnp.asarray(a, jnp.float32)
    md = lambda a: jnp.asarray(a, matmul_dtype)

    # Dense per-direction input-projection weights [E, 3H], columns r|z|n.
    wih_f = md(f32(params["w_ih_f"]).T)
    wih_b = md(f32(params["w_ih_b"]).T)

    # Block-diagonal hidden-projection weight [2H, 6H], direction-blocked cols:
    # rows 0:H (h_f) -> cols 0:3H, rows H:2H (h_b) -> cols 3H:6H.
    whh = jnp.zeros((H2, H6), jnp.float32)
    whh = whh.at[0:H, 0:H3].set(f32(params["w_hh_f"]).T)
    whh = whh.at[H:H2, H3:H6].set(f32(params["w_hh_b"]).T)
    whh = md(whh)

    def gate(v, g):
        return f32(v[g * H:(g + 1) * H])

    # Pre-folded biases: b_ih for all gates, + b_hh for the r/z gates.  Only the
    # n-gate b_hh stays separate (it sits inside r * (gh_n + b_hh_n)).
    b_i_f = jnp.concatenate([gate(params["b_ih_f"], 0) + gate(params["b_hh_f"], 0),
                             gate(params["b_ih_f"], 1) + gate(params["b_hh_f"], 1),
                             gate(params["b_ih_f"], 2)]).reshape(1, H3)
    b_i_b = jnp.concatenate([gate(params["b_ih_b"], 0) + gate(params["b_hh_b"], 0),
                             gate(params["b_ih_b"], 1) + gate(params["b_hh_b"], 1),
                             gate(params["b_ih_b"], 2)]).reshape(1, H3)
    b_hh_n = jnp.concatenate([gate(params["b_hh_f"], 2),
                              gate(params["b_hh_b"], 2)]).reshape(1, H2)

    w_fc_t = md(f32(params["w_fc"]).T)                 # [2H, D]
    b_fc = f32(params["b_fc"]).reshape(1, D)

    # Batch tile: multiple of 8 (sublane alignment).  For v7x / large B, pick
    # bt <= B/2 so the "parallel" grid axis shards across both TensorCores and
    # gi_f/gi_b (+ double-buffered blocks) fit 64 MiB VMEM.
    if bt is None:
        bt = min(128, ((B + 7) // 8) * 8)
    B_pad = ((B + bt - 1) // bt) * bt
    if B_pad != B:
        emb = jnp.pad(emb, ((0, 0), (0, B_pad - B), (0, 0)))  # padded rows unused
    emb_m = md(emb)

    full = lambda r, c: pl.BlockSpec((r, c), lambda b: (0, 0))
    in_specs = [
        pl.BlockSpec((S, bt, E), lambda b: (0, b, 0)),
        full(E, H3), full(E, H3), full(1, H3), full(1, H3),
        full(H2, H6), full(1, H2), full(H2, D), full(1, D),
    ]
    out_specs = (
        pl.BlockSpec((S, bt, H2), lambda b: (0, b, 0)),
        pl.BlockSpec((bt, D), lambda b: (b, 0)),
    )

    outputs, hidden = pl.pallas_call(
        encoder_kernel,
        out_shape=(jax.ShapeDtypeStruct((S, B_pad, H2), jnp.float32),
                   jax.ShapeDtypeStruct((B_pad, D), jnp.float32)),
        grid=(B_pad // bt,),
        in_specs=in_specs,
        out_specs=out_specs,
        compiler_params=pltpu.CompilerParams(
            dimension_semantics=("parallel",)),
    )(emb_m, wih_f, wih_b, b_i_f, b_i_b, whh, b_hh_n, w_fc_t, b_fc)

    if B_pad != B:
        outputs = outputs[:, :B]
        hidden = hidden[:B]
    return outputs, hidden


# ---------------- pure-JAX reference (for correctness check) ----------------
def reference_forward(src, params):
    emb = params["embedding"][src].astype(jnp.float32)
    S, B, E = emb.shape
    H = params["w_hh_f"].shape[1]

    def run_dir(xs, w_ih, w_hh, b_ih, b_hh, reverse):
        if reverse:
            xs = xs[::-1]

        def cell(h, x_t):
            gi = x_t @ w_ih.T + b_ih
            gh = h @ w_hh.T + b_hh
            r = jax.nn.sigmoid(gi[:, :H] + gh[:, :H])
            z = jax.nn.sigmoid(gi[:, H:2 * H] + gh[:, H:2 * H])
            n = jnp.tanh(gi[:, 2 * H:] + r * gh[:, 2 * H:])
            h_new = (1.0 - z) * n + z * h
            return h_new, h_new

        h_final, hs = lax.scan(cell, jnp.zeros((B, H), jnp.float32), xs)
        if reverse:
            hs = hs[::-1]
        return hs, h_final

    hs_f, hf = run_dir(emb, params["w_ih_f"], params["w_hh_f"],
                       params["b_ih_f"], params["b_hh_f"], False)
    hs_b, hb = run_dir(emb, params["w_ih_b"], params["w_hh_b"],
                       params["b_ih_b"], params["b_hh_b"], True)
    outputs = jnp.concatenate([hs_f, hs_b], axis=-1)
    hidden = jnp.tanh(jnp.concatenate([hf, hb], axis=-1) @ params["w_fc"].T
                      + params["b_fc"])
    return outputs, hidden


def init_params(key, V, E, H, D):
    ks = jax.random.split(key, 12)
    k = 1.0 / jnp.sqrt(H)
    u = lambda kk, shape, s: jax.random.uniform(kk, shape, jnp.float32, -s, s)
    return {
        "embedding": jax.random.normal(ks[0], (V, E), jnp.float32),
        "w_ih_f": u(ks[1], (3 * H, E), k), "w_hh_f": u(ks[2], (3 * H, H), k),
        "b_ih_f": u(ks[3], (3 * H,), k),  "b_hh_f": u(ks[4], (3 * H,), k),
        "w_ih_b": u(ks[5], (3 * H, E), k), "w_hh_b": u(ks[6], (3 * H, H), k),
        "b_ih_b": u(ks[7], (3 * H,), k),  "b_hh_b": u(ks[8], (3 * H,), k),
        "w_fc": u(ks[9], (D, 2 * H), 1.0 / jnp.sqrt(2 * H)),
        "b_fc": u(ks[10], (D,), 1.0 / jnp.sqrt(2 * H)),
    }


if __name__ == "__main__":
    V, E, H, D = 50, 32, 32, 32     # input_dim, emb_dim, enc_hid_dim, dec_hid_dim
    S, B = 8, 4                     # seq len, batch

    key = jax.random.PRNGKey(0)
    k_params, k_src = jax.random.split(key)
    params = init_params(k_params, V, E, H, D)
    src = jax.random.randint(k_src, (S, B), 0, V, dtype=jnp.int32)

    out_ref, hid_ref = reference_forward(src, params)

    # Exactness check: f32 MXU operands (structure/bias-folding identical to ref).
    out32, hid32 = encoder_forward(src, params, matmul_dtype=jnp.float32)
    jax.block_until_ready((out32, hid32))
    assert out32.shape == (S, B, 2 * H) and hid32.shape == (B, D)
    assert jnp.allclose(out32, out_ref, rtol=1e-4, atol=1e-4)
    assert jnp.allclose(hid32, hid_ref, rtol=1e-4, atol=1e-4)

    # Perf path: bf16 MXU operands, f32 accumulation / state / gate math.
    out_bf, hid_bf = encoder_forward(src, params, matmul_dtype=jnp.bfloat16)
    jax.block_until_ready((out_bf, hid_bf))
    assert out_bf.shape == (S, B, 2 * H) and hid_bf.shape == (B, D)
    assert jnp.allclose(out_bf, out_ref, rtol=5e-2, atol=5e-2)
    assert jnp.allclose(hid_bf, hid_ref, rtol=5e-2, atol=5e-2)

    print("KERNEL_OK")
</pallas_src>

<mosaic_0001>
module attributes {stable_mosaic.version = 11 : i64} {
  func.func @encoder_kernel(%arg0: i32, %arg1: memref<8x8x32xf32, #tpu.memory_space<vmem>>, %arg2: memref<32x96xf32, #tpu.memory_space<vmem>>, %arg3: memref<32x96xf32, #tpu.memory_space<vmem>>, %arg4: memref<1x96xf32, #tpu.memory_space<vmem>>, %arg5: memref<1x96xf32, #tpu.memory_space<vmem>>, %arg6: memref<64x192xf32, #tpu.memory_space<vmem>>, %arg7: memref<1x64xf32, #tpu.memory_space<vmem>>, %arg8: memref<64x32xf32, #tpu.memory_space<vmem>>, %arg9: memref<1x32xf32, #tpu.memory_space<vmem>>, %arg10: memref<8x8x64xf32, #tpu.memory_space<vmem>>, %arg11: memref<8x32xf32, #tpu.memory_space<vmem>>) attributes {dimension_semantics = [#tpu.dimension_semantics<parallel>], iteration_bounds = array<i64: 1>, scalar_prefetch = 0 : i64, scratch_operands = 0 : i64, tpu.core_type = #tpu.core_type<tc>, window_params = [{transform_indices = @transform_0, window_bounds = array<i64: 8, 8, 32>}, {pipeline_mode = #tpu.pipeline_mode<synchronous>, transform_indices = @transform_1, window_bounds = array<i64: 32, 96>}, {pipeline_mode = #tpu.pipeline_mode<synchronous>, transform_indices = @transform_2, window_bounds = array<i64: 32, 96>}, {pipeline_mode = #tpu.pipeline_mode<synchronous>, transform_indices = @transform_3, window_bounds = array<i64: 1, 96>}, {pipeline_mode = #tpu.pipeline_mode<synchronous>, transform_indices = @transform_4, window_bounds = array<i64: 1, 96>}, {pipeline_mode = #tpu.pipeline_mode<synchronous>, transform_indices = @transform_5, window_bounds = array<i64: 64, 192>}, {pipeline_mode = #tpu.pipeline_mode<synchronous>, transform_indices = @transform_6, window_bounds = array<i64: 1, 64>}, {pipeline_mode = #tpu.pipeline_mode<synchronous>, transform_indices = @transform_7, window_bounds = array<i64: 64, 32>}, {pipeline_mode = #tpu.pipeline_mode<synchronous>, transform_indices = @transform_8, window_bounds = array<i64: 1, 32>}, {transform_indices = @transform_9, window_bounds = array<i64: 8, 8, 64>}, {transform_indices = @transform_10, window_bounds = array<i64: 8, 32>}]} {
    %c0 = arith.constant 0 : index
    %c0_0 = arith.constant 0 : index
    %0 = vector.load %arg6[%c0, %c0_0] : memref<64x192xf32, #tpu.memory_space<vmem>>, vector<64x192xf32>
    %c0_1 = arith.constant 0 : index
    %c0_2 = arith.constant 0 : index
    %1 = vector.load %arg7[%c0_1, %c0_2] : memref<1x64xf32, #tpu.memory_space<vmem>>, vector<1x32xf32>
    %2 = vector.shape_cast %1 : vector<1x32xf32> to vector<1x32xf32>
    %3 = vector.broadcast %2 : vector<1x32xf32> to vector<8x32xf32>
    %c0_3 = arith.constant 0 : index
    %c32 = arith.constant 32 : index
    %4 = vector.load %arg7[%c0_3, %c32] : memref<1x64xf32, #tpu.memory_space<vmem>>, vector<1x32xf32>
    %5 = vector.shape_cast %4 : vector<1x32xf32> to vector<1x32xf32>
    %6 = vector.broadcast %5 : vector<1x32xf32> to vector<8x32xf32>
    %c0_4 = arith.constant 0 : index
    %c0_5 = arith.constant 0 : index
    %c0_6 = arith.constant 0 : index
    %7 = vector.load %arg1[%c0_4, %c0_5, %c0_6] : memref<8x8x32xf32, #tpu.memory_space<vmem>>, vector<8x8x32xf32>
    %8 = vector.shape_cast %7 : vector<8x8x32xf32> to vector<64x32xf32>
    %c0_7 = arith.constant 0 : index
    %c0_8 = arith.constant 0 : index
    %9 = vector.load %arg2[%c0_7, %c0_8] : memref<32x96xf32, #tpu.memory_space<vmem>>, vector<32x96xf32>
    %cst = arith.constant dense<0.000000e+00> : vector<64x96xf32>
    %10 = tpu.matmul %8, %9, %cst {dimension_numbers = #tpu.dot_dimension_numbers<[1], [0], [0], [1], [0, 0, 1, 1], [], []>} : vector<64x32xf32>, vector<32x96xf32>, vector<64x96xf32> -> vector<64x96xf32>
    %c0_9 = arith.constant 0 : index
    %c0_10 = arith.constant 0 : index
    %11 = vector.load %arg4[%c0_9, %c0_10] : memref<1x96xf32, #tpu.memory_space<vmem>>, vector<1x96xf32>
    %12 = vector.broadcast %11 : vector<1x96xf32> to vector<64x96xf32>
    %13 = arith.addf %10, %12 : vector<64x96xf32>
    %14 = vector.shape_cast %13 : vector<64x96xf32> to vector<8x8x96xf32>
    %c0_11 = arith.constant 0 : index
    %c0_12 = arith.constant 0 : index
    %15 = vector.load %arg3[%c0_11, %c0_12] : memref<32x96xf32, #tpu.memory_space<vmem>>, vector<32x96xf32>
    %cst_13 = arith.constant dense<0.000000e+00> : vector<64x96xf32>
    %16 = tpu.matmul %8, %15, %cst_13 {dimension_numbers = #tpu.dot_dimension_numbers<[1], [0], [0], [1], [0, 0, 1, 1], [], []>} : vector<64x32xf32>, vector<32x96xf32>, vector<64x96xf32> -> vector<64x96xf32>
    %c0_14 = arith.constant 0 : index
    %c0_15 = arith.constant 0 : index
    %17 = vector.load %arg5[%c0_14, %c0_15] : memref<1x96xf32, #tpu.memory_space<vmem>>, vector<1x96xf32>
    %18 = vector.broadcast %17 : vector<1x96xf32> to vector<64x96xf32>
    %19 = arith.addf %16, %18 : vector<64x96xf32>
    %20 = vector.shape_cast %19 : vector<64x96xf32> to vector<8x8x96xf32>
    %cst_16 = arith.constant 0.000000e+00 : f32
    %21 = vector.broadcast %cst_16 : f32 to vector<8x32xf32>
    %cst_17 = arith.constant 0.000000e+00 : f32
    %22 = vector.broadcast %cst_17 : f32 to vector<8x32xf32>
    %23 = tpu.concatenate %21, %22 in 1 : vector<8x32xf32>, vector<8x32xf32> -> vector<8x64xf32>
    %cst_18 = arith.constant dense<0.000000e+00> : vector<8x192xf32>
    %24 = tpu.matmul %23, %0, %cst_18 {dimension_numbers = #tpu.dot_dimension_numbers<[1], [0], [0], [1], [0, 0, 1, 1], [], []>} : vector<8x64xf32>, vector<64x192xf32>, vector<8x192xf32> -> vector<8x192xf32>
    %25 = vector.extract_strided_slice %14 {offsets = [0, 0, 0], sizes = [1, 8, 96], strides = [1, 1, 1]} : vector<8x8x96xf32> to vector<1x8x96xf32>
    %26 = vector.shape_cast %25 : vector<1x8x96xf32> to vector<8x96xf32>
    %27 = vector.extract_strided_slice %20 {offsets = [7, 0, 0], sizes = [1, 8, 96], strides = [1, 1, 1]} : vector<8x8x96xf32> to vector<1x8x96xf32>
    %28 = vector.shape_cast %27 : vector<1x8x96xf32> to vector<8x96xf32>
    %29 = vector.extract_strided_slice %26 {offsets = [0, 0], sizes = [8, 32], strides = [1, 1]} : vector<8x96xf32> to vector<8x32xf32>
    %30 = vector.extract_strided_slice %24 {offsets = [0, 0], sizes = [8, 32], strides = [1, 1]} : vector<8x192xf32> to vector<8x32xf32>
    %31 = arith.addf %29, %30 : vector<8x32xf32>
    %32 = arith.negf %31 : vector<8x32xf32>
    %33 = math.exp %32 : vector<8x32xf32>
    %cst_19 = arith.constant 1.000000e+00 : f32
    %34 = vector.broadcast %cst_19 : f32 to vector<8x32xf32>
    %35 = arith.addf %34, %33 : vector<8x32xf32>
    %36 = arith.divf %34, %35 : vector<8x32xf32>
    %37 = vector.extract_strided_slice %26 {offsets = [0, 32], sizes = [8, 32], strides = [1, 1]} : vector<8x96xf32> to vector<8x32xf32>
    %38 = vector.extract_strided_slice %24 {offsets = [0, 32], sizes = [8, 32], strides = [1, 1]} : vector<8x192xf32> to vector<8x32xf32>
    %39 = arith.addf %37, %38 : vector<8x32xf32>
    %40 = arith.negf %39 : vector<8x32xf32>
    %41 = math.exp %40 : vector<8x32xf32>
    %cst_20 = arith.constant 1.000000e+00 : f32
    %42 = vector.broadcast %cst_20 : f32 to vector<8x32xf32>
    %43 = arith.addf %42, %41 : vector<8x32xf32>
    %44 = arith.divf %42, %43 : vector<8x32xf32>
    %45 = vector.extract_strided_slice %26 {offsets = [0, 64], sizes = [8, 32], strides = [1, 1]} : vector<8x96xf32> to vector<8x32xf32>
    %46 = vector.extract_strided_slice %24 {offsets = [0, 64], sizes = [8, 32], strides = [1, 1]} : vector<8x192xf32> to vector<8x32xf32>
    %47 = arith.addf %46, %3 : vector<8x32xf32>
    %48 = arith.mulf %36, %47 : vector<8x32xf32>
    %49 = arith.addf %45, %48 : vector<8x32xf32>
    %50 = math.tanh %49 : vector<8x32xf32>
    %cst_21 = arith.constant 1.000000e+00 : f32
    %51 = vector.broadcast %cst_21 : f32 to vector<8x32xf32>
    %52 = arith.subf %51, %44 : vector<8x32xf32>
    %53 = arith.mulf %52, %50 : vector<8x32xf32>
    %54 = arith.mulf %44, %21 : vector<8x32xf32>
    %55 = arith.addf %53, %54 : vector<8x32xf32>
    %56 = vector.extract_strided_slice %28 {offsets = [0, 0], sizes = [8, 32], strides = [1, 1]} : vector<8x96xf32> to vector<8x32xf32>
    %57 = vector.extract_strided_slice %24 {offsets = [0, 96], sizes = [8, 32], strides = [1, 1]} : vector<8x192xf32> to vector<8x32xf32>
    %58 = arith.addf %56, %57 : vector<8x32xf32>
    %59 = arith.negf %58 : vector<8x32xf32>
    %60 = math.exp %59 : vector<8x32xf32>
    %cst_22 = arith.constant 1.000000e+00 : f32
    %61 = vector.broadcast %cst_22 : f32 to vector<8x32xf32>
    %62 = arith.addf %61, %60 : vector<8x32xf32>
    %63 = arith.divf %61, %62 : vector<8x32xf32>
    %64 = vector.extract_strided_slice %28 {offsets = [0, 32], sizes = [8, 32], strides = [1, 1]} : vector<8x96xf32> to vector<8x32xf32>
    %65 = vector.extract_strided_slice %24 {offsets = [0, 128], sizes = [8, 32], strides = [1, 1]} : vector<8x192xf32> to vector<8x32xf32>
    %66 = arith.addf %64, %65 : vector<8x32xf32>
    %67 = arith.negf %66 : vector<8x32xf32>
    %68 = math.exp %67 : vector<8x32xf32>
    %cst_23 = arith.constant 1.000000e+00 : f32
    %69 = vector.broadcast %cst_23 : f32 to vector<8x32xf32>
    %70 = arith.addf %69, %68 : vector<8x32xf32>
    %71 = arith.divf %69, %70 : vector<8x32xf32>
    %72 = vector.extract_strided_slice %28 {offsets = [0, 64], sizes = [8, 32], strides = [1, 1]} : vector<8x96xf32> to vector<8x32xf32>
    %73 = vector.extract_strided_slice %24 {offsets = [0, 160], sizes = [8, 32], strides = [1, 1]} : vector<8x192xf32> to vector<8x32xf32>
    %74 = arith.addf %73, %6 : vector<8x32xf32>
    %75 = arith.mulf %63, %74 : vector<8x32xf32>
    %76 = arith.addf %72, %75 : vector<8x32xf32>
    %77 = math.tanh %76 : vector<8x32xf32>
    %cst_24 = arith.constant 1.000000e+00 : f32
    %78 = vector.broadcast %cst_24 : f32 to vector<8x32xf32>
    %79 = arith.subf %78, %71 : vector<8x32xf32>
    %80 = arith.mulf %79, %77 : vector<8x32xf32>
    %81 = arith.mulf %71, %22 : vector<8x32xf32>
    %82 = arith.addf %80, %81 : vector<8x32xf32>
    %83 = tpu.concatenate %55, %82 in 1 : vector<8x32xf32>, vector<8x32xf32> -> vector<8x64xf32>
    %cst_25 = arith.constant dense<0.000000e+00> : vector<8x192xf32>
    %84 = tpu.matmul %83, %0, %cst_25 {dimension_numbers = #tpu.dot_dimension_numbers<[1], [0], [0], [1], [0, 0, 1, 1], [], []>} : vector<8x64xf32>, vector<64x192xf32>, vector<8x192xf32> -> vector<8x192xf32>
    %85 = vector.extract_strided_slice %14 {offsets = [1, 0, 0], sizes = [1, 8, 96], strides = [1, 1, 1]} : vector<8x8x96xf32> to vector<1x8x96xf32>
    %86 = vector.shape_cast %85 : vector<1x8x96xf32> to vector<8x96xf32>
    %87 = vector.extract_strided_slice %20 {offsets = [6, 0, 0], sizes = [1, 8, 96], strides = [1, 1, 1]} : vector<8x8x96xf32> to vector<1x8x96xf32>
    %88 = vector.shape_cast %87 : vector<1x8x96xf32> to vector<8x96xf32>
    %89 = vector.extract_strided_slice %86 {offsets = [0, 0], sizes = [8, 32], strides = [1, 1]} : vector<8x96xf32> to vector<8x32xf32>
    %90 = vector.extract_strided_slice %84 {offsets = [0, 0], sizes = [8, 32], strides = [1, 1]} : vector<8x192xf32> to vector<8x32xf32>
    %91 = arith.addf %89, %90 : vector<8x32xf32>
    %92 = arith.negf %91 : vector<8x32xf32>
    %93 = math.exp %92 : vector<8x32xf32>
    %cst_26 = arith.constant 1.000000e+00 : f32
    %94 = vector.broadcast %cst_26 : f32 to vector<8x32xf32>
    %95 = arith.addf %94, %93 : vector<8x32xf32>
    %96 = arith.divf %94, %95 : vector<8x32xf32>
    %97 = vector.extract_strided_slice %86 {offsets = [0, 32], sizes = [8, 32], strides = [1, 1]} : vector<8x96xf32> to vector<8x32xf32>
    %98 = vector.extract_strided_slice %84 {offsets = [0, 32], sizes = [8, 32], strides = [1, 1]} : vector<8x192xf32> to vector<8x32xf32>
    %99 = arith.addf %97, %98 : vector<8x32xf32>
    %100 = arith.negf %99 : vector<8x32xf32>
    %101 = math.exp %100 : vector<8x32xf32>
    %cst_27 = arith.constant 1.000000e+00 : f32
    %102 = vector.broadcast %cst_27 : f32 to vector<8x32xf32>
    %103 = arith.addf %102, %101 : vector<8x32xf32>
    %104 = arith.divf %102, %103 : vector<8x32xf32>
    %105 = vector.extract_strided_slice %86 {offsets = [0, 64], sizes = [8, 32], strides = [1, 1]} : vector<8x96xf32> to vector<8x32xf32>
    %106 = vector.extract_strided_slice %84 {offsets = [0, 64], sizes = [8, 32], strides = [1, 1]} : vector<8x192xf32> to vector<8x32xf32>
    %107 = arith.addf %106, %3 : vector<8x32xf32>
    %108 = arith.mulf %96, %107 : vector<8x32xf32>
    %109 = arith.addf %105, %108 : vector<8x32xf32>
    %110 = math.tanh %109 : vector<8x32xf32>
    %cst_28 = arith.constant 1.000000e+00 : f32
    %111 = vector.broadcast %cst_28 : f32 to vector<8x32xf32>
    %112 = arith.subf %111, %104 : vector<8x32xf32>
    %113 = arith.mulf %112, %110 : vector<8x32xf32>
    %114 = arith.mulf %104, %55 : vector<8x32xf32>
    %115 = arith.addf %113, %114 : vector<8x32xf32>
    %116 = vector.extract_strided_slice %88 {offsets = [0, 0], sizes = [8, 32], strides = [1, 1]} : vector<8x96xf32> to vector<8x32xf32>
    %117 = vector.extract_strided_slice %84 {offsets = [0, 96], sizes = [8, 32], strides = [1, 1]} : vector<8x192xf32> to vector<8x32xf32>
    %118 = arith.addf %116, %117 : vector<8x32xf32>
    %119 = arith.negf %118 : vector<8x32xf32>
    %120 = math.exp %119 : vector<8x32xf32>
    %cst_29 = arith.constant 1.000000e+00 : f32
    %121 = vector.broadcast %cst_29 : f32 to vector<8x32xf32>
    %122 = arith.addf %121, %120 : vector<8x32xf32>
    %123 = arith.divf %121, %122 : vector<8x32xf32>
    %124 = vector.extract_strided_slice %88 {offsets = [0, 32], sizes = [8, 32], strides = [1, 1]} : vector<8x96xf32> to vector<8x32xf32>
    %125 = vector.extract_strided_slice %84 {offsets = [0, 128], sizes = [8, 32], strides = [1, 1]} : vector<8x192xf32> to vector<8x32xf32>
    %126 = arith.addf %124, %125 : vector<8x32xf32>
    %127 = arith.negf %126 : vector<8x32xf32>
    %128 = math.exp %127 : vector<8x32xf32>
    %cst_30 = arith.constant 1.000000e+00 : f32
    %129 = vector.broadcast %cst_30 : f32 to vector<8x32xf32>
    %130 = arith.addf %129, %128 : vector<8x32xf32>
    %131 = arith.divf %129, %130 : vector<8x32xf32>
    %132 = vector.extract_strided_slice %88 {offsets = [0, 64], sizes = [8, 32], strides = [1, 1]} : vector<8x96xf32> to vector<8x32xf32>
    %133 = vector.extract_strided_slice %84 {offsets = [0, 160], sizes = [8, 32], strides = [1, 1]} : vector<8x192xf32> to vector<8x32xf32>
    %134 = arith.addf %133, %6 : vector<8x32xf32>
    %135 = arith.mulf %123, %134 : vector<8x32xf32>
    %136 = arith.addf %132, %135 : vector<8x32xf32>
    %137 = math.tanh %136 : vector<8x32xf32>
    %cst_31 = arith.constant 1.000000e+00 : f32
    %138 = vector.broadcast %cst_31 : f32 to vector<8x32xf32>
    %139 = arith.subf %138, %131 : vector<8x32xf32>
    %140 = arith.mulf %139, %137 : vector<8x32xf32>
    %141 = arith.mulf %131, %82 : vector<8x32xf32>
    %142 = arith.addf %140, %141 : vector<8x32xf32>
    %143 = tpu.concatenate %115, %142 in 1 : vector<8x32xf32>, vector<8x32xf32> -> vector<8x64xf32>
    %cst_32 = arith.constant dense<0.000000e+00> : vector<8x192xf32>
    %144 = tpu.matmul %143, %0, %cst_32 {dimension_numbers = #tpu.dot_dimension_numbers<[1], [0], [0], [1], [0, 0, 1, 1], [], []>} : vector<8x64xf32>, vector<64x192xf32>, vector<8x192xf32> -> vector<8x192xf32>
    %145 = vector.extract_strided_slice %14 {offsets = [2, 0, 0], sizes = [1, 8, 96], strides = [1, 1, 1]} : vector<8x8x96xf32> to vector<1x8x96xf32>
    %146 = vector.shape_cast %145 : vector<1x8x96xf32> to vector<8x96xf32>
    %147 = vector.extract_strided_slice %20 {offsets = [5, 0, 0], sizes = [1, 8, 96], strides = [1, 1, 1]} : vector<8x8x96xf32> to vector<1x8x96xf32>
    %148 = vector.shape_cast %147 : vector<1x8x96xf32> to vector<8x96xf32>
    %149 = vector.extract_strided_slice %146 {offsets = [0, 0], sizes = [8, 32], strides = [1, 1]} : vector<8x96xf32> to vector<8x32xf32>
    %150 = vector.extract_strided_slice %144 {offsets = [0, 0], sizes = [8, 32], strides = [1, 1]} : vector<8x192xf32> to vector<8x32xf32>
    %151 = arith.addf %149, %150 : vector<8x32xf32>
    %152 = arith.negf %151 : vector<8x32xf32>
    %153 = math.exp %152 : vector<8x32xf32>
    %cst_33 = arith.constant 1.000000e+00 : f32
    %154 = vector.broadcast %cst_33 : f32 to vector<8x32xf32>
    %155 = arith.addf %154, %153 : vector<8x32xf32>
    %156 = arith.divf %154, %155 : vector<8x32xf32>
    %157 = vector.extract_strided_slice %146 {offsets = [0, 32], sizes = [8, 32], strides = [1, 1]} : vector<8x96xf32> to vector<8x32xf32>
    %158 = vector.extract_strided_slice %144 {offsets = [0, 32], sizes = [8, 32], strides = [1, 1]} : vector<8x192xf32> to vector<8x32xf32>
    %159 = arith.addf %157, %158 : vector<8x32xf32>
    %160 = arith.negf %159 : vector<8x32xf32>
    %161 = math.exp %160 : vector<8x32xf32>
    %cst_34 = arith.constant 1.000000e+00 : f32
    %162 = vector.broadcast %cst_34 : f32 to vector<8x32xf32>
    %163 = arith.addf %162, %161 : vector<8x32xf32>
    %164 = arith.divf %162, %163 : vector<8x32xf32>
    %165 = vector.extract_strided_slice %146 {offsets = [0, 64], sizes = [8, 32], strides = [1, 1]} : vector<8x96xf32> to vector<8x32xf32>
    %166 = vector.extract_strided_slice %144 {offsets = [0, 64], sizes = [8, 32], strides = [1, 1]} : vector<8x192xf32> to vector<8x32xf32>
    %167 = arith.addf %166, %3 : vector<8x32xf32>
    %168 = arith.mulf %156, %167 : vector<8x32xf32>
    %169 = arith.addf %165, %168 : vector<8x32xf32>
    %170 = math.tanh %169 : vector<8x32xf32>
    %cst_35 = arith.constant 1.000000e+00 : f32
    %171 = vector.broadcast %cst_35 : f32 to vector<8x32xf32>
    %172 = arith.subf %171, %164 : vector<8x32xf32>
    %173 = arith.mulf %172, %170 : vector<8x32xf32>
    %174 = arith.mulf %164, %115 : vector<8x32xf32>
    %175 = arith.addf %173, %174 : vector<8x32xf32>
    %176 = vector.extract_strided_slice %148 {offsets = [0, 0], sizes = [8, 32], strides = [1, 1]} : vector<8x96xf32> to vector<8x32xf32>
    %177 = vector.extract_strided_slice %144 {offsets = [0, 96], sizes = [8, 32], strides = [1, 1]} : vector<8x192xf32> to vector<8x32xf32>
    %178 = arith.addf %176, %177 : vector<8x32xf32>
    %179 = arith.negf %178 : vector<8x32xf32>
    %180 = math.exp %179 : vector<8x32xf32>
    %cst_36 = arith.constant 1.000000e+00 : f32
    %181 = vector.broadcast %cst_36 : f32 to vector<8x32xf32>
    %182 = arith.addf %181, %180 : vector<8x32xf32>
    %183 = arith.divf %181, %182 : vector<8x32xf32>
    %184 = vector.extract_strided_slice %148 {offsets = [0, 32], sizes = [8, 32], strides = [1, 1]} : vector<8x96xf32> to vector<8x32xf32>
    %185 = vector.extract_strided_slice %144 {offsets = [0, 128], sizes = [8, 32], strides = [1, 1]} : vector<8x192xf32> to vector<8x32xf32>
    %186 = arith.addf %184, %185 : vector<8x32xf32>
    %187 = arith.negf %186 : vector<8x32xf32>
    %188 = math.exp %187 : vector<8x32xf32>
    %cst_37 = arith.constant 1.000000e+00 : f32
    %189 = vector.broadcast %cst_37 : f32 to vector<8x32xf32>
    %190 = arith.addf %189, %188 : vector<8x32xf32>
    %191 = arith.divf %189, %190 : vector<8x32xf32>
    %192 = vector.extract_strided_slice %148 {offsets = [0, 64], sizes = [8, 32], strides = [1, 1]} : vector<8x96xf32> to vector<8x32xf32>
    %193 = vector.extract_strided_slice %144 {offsets = [0, 160], sizes = [8, 32], strides = [1, 1]} : vector<8x192xf32> to vector<8x32xf32>
    %194 = arith.addf %193, %6 : vector<8x32xf32>
    %195 = arith.mulf %183, %194 : vector<8x32xf32>
    %196 = arith.addf %192, %195 : vector<8x32xf32>
    %197 = math.tanh %196 : vector<8x32xf32>
    %cst_38 = arith.constant 1.000000e+00 : f32
    %198 = vector.broadcast %cst_38 : f32 to vector<8x32xf32>
    %199 = arith.subf %198, %191 : vector<8x32xf32>
    %200 = arith.mulf %199, %197 : vector<8x32xf32>
    %201 = arith.mulf %191, %142 : vector<8x32xf32>
    %202 = arith.addf %200, %201 : vector<8x32xf32>
    %203 = tpu.concatenate %175, %202 in 1 : vector<8x32xf32>, vector<8x32xf32> -> vector<8x64xf32>
    %cst_39 = arith.constant dense<0.000000e+00> : vector<8x192xf32>
    %204 = tpu.matmul %203, %0, %cst_39 {dimension_numbers = #tpu.dot_dimension_numbers<[1], [0], [0], [1], [0, 0, 1, 1], [], []>} : vector<8x64xf32>, vector<64x192xf32>, vector<8x192xf32> -> vector<8x192xf32>
    %205 = vector.extract_strided_slice %14 {offsets = [3, 0, 0], sizes = [1, 8, 96], strides = [1, 1, 1]} : vector<8x8x96xf32> to vector<1x8x96xf32>
    %206 = vector.shape_cast %205 : vector<1x8x96xf32> to vector<8x96xf32>
    %207 = vector.extract_strided_slice %20 {offsets = [4, 0, 0], sizes = [1, 8, 96], strides = [1, 1, 1]} : vector<8x8x96xf32> to vector<1x8x96xf32>
    %208 = vector.shape_cast %207 : vector<1x8x96xf32> to vector<8x96xf32>
    %209 = vector.extract_strided_slice %206 {offsets = [0, 0], sizes = [8, 32], strides = [1, 1]} : vector<8x96xf32> to vector<8x32xf32>
    %210 = vector.extract_strided_slice %204 {offsets = [0, 0], sizes = [8, 32], strides = [1, 1]} : vector<8x192xf32> to vector<8x32xf32>
    %211 = arith.addf %209, %210 : vector<8x32xf32>
    %212 = arith.negf %211 : vector<8x32xf32>
    %213 = math.exp %212 : vector<8x32xf32>
    %cst_40 = arith.constant 1.000000e+00 : f32
    %214 = vector.broadcast %cst_40 : f32 to vector<8x32xf32>
    %215 = arith.addf %214, %213 : vector<8x32xf32>
    %216 = arith.divf %214, %215 : vector<8x32xf32>
    %217 = vector.extract_strided_slice %206 {offsets = [0, 32], sizes = [8, 32], strides = [1, 1]} : vector<8x96xf32> to vector<8x32xf32>
    %218 = vector.extract_strided_slice %204 {offsets = [0, 32], sizes = [8, 32], strides = [1, 1]} : vector<8x192xf32> to vector<8x32xf32>
    %219 = arith.addf %217, %218 : vector<8x32xf32>
    %220 = arith.negf %219 : vector<8x32xf32>
    %221 = math.exp %220 : vector<8x32xf32>
    %cst_41 = arith.constant 1.000000e+00 : f32
    %222 = vector.broadcast %cst_41 : f32 to vector<8x32xf32>
    %223 = arith.addf %222, %221 : vector<8x32xf32>
    %224 = arith.divf %222, %223 : vector<8x32xf32>
    %225 = vector.extract_strided_slice %206 {offsets = [0, 64], sizes = [8, 32], strides = [1, 1]} : vector<8x96xf32> to vector<8x32xf32>
    %226 = vector.extract_strided_slice %204 {offsets = [0, 64], sizes = [8, 32], strides = [1, 1]} : vector<8x192xf32> to vector<8x32xf32>
    %227 = arith.addf %226, %3 : vector<8x32xf32>
    %228 = arith.mulf %216, %227 : vector<8x32xf32>
    %229 = arith.addf %225, %228 : vector<8x32xf32>
    %230 = math.tanh %229 : vector<8x32xf32>
    %cst_42 = arith.constant 1.000000e+00 : f32
    %231 = vector.broadcast %cst_42 : f32 to vector<8x32xf32>
    %232 = arith.subf %231, %224 : vector<8x32xf32>
    %233 = arith.mulf %232, %230 : vector<8x32xf32>
    %234 = arith.mulf %224, %175 : vector<8x32xf32>
    %235 = arith.addf %233, %234 : vector<8x32xf32>
    %236 = vector.extract_strided_slice %208 {offsets = [0, 0], sizes = [8, 32], strides = [1, 1]} : vector<8x96xf32> to vector<8x32xf32>
    %237 = vector.extract_strided_slice %204 {offsets = [0, 96], sizes = [8, 32], strides = [1, 1]} : vector<8x192xf32> to vector<8x32xf32>
    %238 = arith.addf %236, %237 : vector<8x32xf32>
    %239 = arith.negf %238 : vector<8x32xf32>
    %240 = math.exp %239 : vector<8x32xf32>
    %cst_43 = arith.constant 1.000000e+00 : f32
    %241 = vector.broadcast %cst_43 : f32 to vector<8x32xf32>
    %242 = arith.addf %241, %240 : vector<8x32xf32>
    %243 = arith.divf %241, %242 : vector<8x32xf32>
    %244 = vector.extract_strided_slice %208 {offsets = [0, 32], sizes = [8, 32], strides = [1, 1]} : vector<8x96xf32> to vector<8x32xf32>
    %245 = vector.extract_strided_slice %204 {offsets = [0, 128], sizes = [8, 32], strides = [1, 1]} : vector<8x192xf32> to vector<8x32xf32>
    %246 = arith.addf %244, %245 : vector<8x32xf32>
    %247 = arith.negf %246 : vector<8x32xf32>
    %248 = math.exp %247 : vector<8x32xf32>
    %cst_44 = arith.constant 1.000000e+00 : f32
    %249 = vector.broadcast %cst_44 : f32 to vector<8x32xf32>
    %250 = arith.addf %249, %248 : vector<8x32xf32>
    %251 = arith.divf %249, %250 : vector<8x32xf32>
    %252 = vector.extract_strided_slice %208 {offsets = [0, 64], sizes = [8, 32], strides = [1, 1]} : vector<8x96xf32> to vector<8x32xf32>
    %253 = vector.extract_strided_slice %204 {offsets = [0, 160], sizes = [8, 32], strides = [1, 1]} : vector<8x192xf32> to vector<8x32xf32>
    %254 = arith.addf %253, %6 : vector<8x32xf32>
    %255 = arith.mulf %243, %254 : vector<8x32xf32>
    %256 = arith.addf %252, %255 : vector<8x32xf32>
    %257 = math.tanh %256 : vector<8x32xf32>
    %cst_45 = arith.constant 1.000000e+00 : f32
    %258 = vector.broadcast %cst_45 : f32 to vector<8x32xf32>
    %259 = arith.subf %258, %251 : vector<8x32xf32>
    %260 = arith.mulf %259, %257 : vector<8x32xf32>
    %261 = arith.mulf %251, %202 : vector<8x32xf32>
    %262 = arith.addf %260, %261 : vector<8x32xf32>
    %263 = tpu.concatenate %235, %262 in 1 : vector<8x32xf32>, vector<8x32xf32> -> vector<8x64xf32>
    %cst_46 = arith.constant dense<0.000000e+00> : vector<8x192xf32>
    %264 = tpu.matmul %263, %0, %cst_46 {dimension_numbers = #tpu.dot_dimension_numbers<[1], [0], [0], [1], [0, 0, 1, 1], [], []>} : vector<8x64xf32>, vector<64x192xf32>, vector<8x192xf32> -> vector<8x192xf32>
    %265 = vector.extract_strided_slice %14 {offsets = [4, 0, 0], sizes = [1, 8, 96], strides = [1, 1, 1]} : vector<8x8x96xf32> to vector<1x8x96xf32>
    %266 = vector.shape_cast %265 : vector<1x8x96xf32> to vector<8x96xf32>
    %267 = vector.extract_strided_slice %20 {offsets = [3, 0, 0], sizes = [1, 8, 96], strides = [1, 1, 1]} : vector<8x8x96xf32> to vector<1x8x96xf32>
    %268 = vector.shape_cast %267 : vector<1x8x96xf32> to vector<8x96xf32>
    %269 = vector.extract_strided_slice %266 {offsets = [0, 0], sizes = [8, 32], strides = [1, 1]} : vector<8x96xf32> to vector<8x32xf32>
    %270 = vector.extract_strided_slice %264 {offsets = [0, 0], sizes = [8, 32], strides = [1, 1]} : vector<8x192xf32> to vector<8x32xf32>
    %271 = arith.addf %269, %270 : vector<8x32xf32>
    %272 = arith.negf %271 : vector<8x32xf32>
    %273 = math.exp %272 : vector<8x32xf32>
    %cst_47 = arith.constant 1.000000e+00 : f32
    %274 = vector.broadcast %cst_47 : f32 to vector<8x32xf32>
    %275 = arith.addf %274, %273 : vector<8x32xf32>
    %276 = arith.divf %274, %275 : vector<8x32xf32>
    %277 = vector.extract_strided_slice %266 {offsets = [0, 32], sizes = [8, 32], strides = [1, 1]} : vector<8x96xf32> to vector<8x32xf32>
    %278 = vector.extract_strided_slice %264 {offsets = [0, 32], sizes = [8, 32], strides = [1, 1]} : vector<8x192xf32> to vector<8x32xf32>
    %279 = arith.addf %277, %278 : vector<8x32xf32>
    %280 = arith.negf %279 : vector<8x32xf32>
    %281 = math.exp %280 : vector<8x32xf32>
    %cst_48 = arith.constant 1.000000e+00 : f32
    %282 = vector.broadcast %cst_48 : f32 to vector<8x32xf32>
    %283 = arith.addf %282, %281 : vector<8x32xf32>
    %284 = arith.divf %282, %283 : vector<8x32xf32>
    %285 = vector.extract_strided_slice %266 {offsets = [0, 64], sizes = [8, 32], strides = [1, 1]} : vector<8x96xf32> to vector<8x32xf32>
    %286 = vector.extract_strided_slice %264 {offsets = [0, 64], sizes = [8, 32], strides = [1, 1]} : vector<8x192xf32> to vector<8x32xf32>
    %287 = arith.addf %286, %3 : vector<8x32xf32>
    %288 = arith.mulf %276, %287 : vector<8x32xf32>
    %289 = arith.addf %285, %288 : vector<8x32xf32>
    %290 = math.tanh %289 : vector<8x32xf32>
    %cst_49 = arith.constant 1.000000e+00 : f32
    %291 = vector.broadcast %cst_49 : f32 to vector<8x32xf32>
    %292 = arith.subf %291, %284 : vector<8x32xf32>
    %293 = arith.mulf %292, %290 : vector<8x32xf32>
    %294 = arith.mulf %284, %235 : vector<8x32xf32>
    %295 = arith.addf %293, %294 : vector<8x32xf32>
    %296 = vector.extract_strided_slice %268 {offsets = [0, 0], sizes = [8, 32], strides = [1, 1]} : vector<8x96xf32> to vector<8x32xf32>
    %297 = vector.extract_strided_slice %264 {offsets = [0, 96], sizes = [8, 32], strides = [1, 1]} : vector<8x192xf32> to vector<8x32xf32>
    %298 = arith.addf %296, %297 : vector<8x32xf32>
    %299 = arith.negf %298 : vector<8x32xf32>
    %300 = math.exp %299 : vector<8x32xf32>
    %cst_50 = arith.constant 1.000000e+00 : f32
    %301 = vector.broadcast %cst_50 : f32 to vector<8x32xf32>
    %302 = arith.addf %301, %300 : vector<8x32xf32>
    %303 = arith.divf %301, %302 : vector<8x32xf32>
    %304 = vector.extract_strided_slice %268 {offsets = [0, 32], sizes = [8, 32], strides = [1, 1]} : vector<8x96xf32> to vector<8x32xf32>
    %305 = vector.extract_strided_slice %264 {offsets = [0, 128], sizes = [8, 32], strides = [1, 1]} : vector<8x192xf32> to vector<8x32xf32>
    %306 = arith.addf %304, %305 : vector<8x32xf32>
    %307 = arith.negf %306 : vector<8x32xf32>
    %308 = math.exp %307 : vector<8x32xf32>
    %cst_51 = arith.constant 1.000000e+00 : f32
    %309 = vector.broadcast %cst_51 : f32 to vector<8x32xf32>
    %310 = arith.addf %309, %308 : vector<8x32xf32>
    %311 = arith.divf %309, %310 : vector<8x32xf32>
    %312 = vector.extract_strided_slice %268 {offsets = [0, 64], sizes = [8, 32], strides = [1, 1]} : vector<8x96xf32> to vector<8x32xf32>
    %313 = vector.extract_strided_slice %264 {offsets = [0, 160], sizes = [8, 32], strides = [1, 1]} : vector<8x192xf32> to vector<8x32xf32>
    %314 = arith.addf %313, %6 : vector<8x32xf32>
    %315 = arith.mulf %303, %314 : vector<8x32xf32>
    %316 = arith.addf %312, %315 : vector<8x32xf32>
    %317 = math.tanh %316 : vector<8x32xf32>
    %cst_52 = arith.constant 1.000000e+00 : f32
    %318 = vector.broadcast %cst_52 : f32 to vector<8x32xf32>
    %319 = arith.subf %318, %311 : vector<8x32xf32>
    %320 = arith.mulf %319, %317 : vector<8x32xf32>
    %321 = arith.mulf %311, %262 : vector<8x32xf32>
    %322 = arith.addf %320, %321 : vector<8x32xf32>
    %323 = tpu.concatenate %295, %322 in 1 : vector<8x32xf32>, vector<8x32xf32> -> vector<8x64xf32>
    %cst_53 = arith.constant dense<0.000000e+00> : vector<8x192xf32>
    %324 = tpu.matmul %323, %0, %cst_53 {dimension_numbers = #tpu.dot_dimension_numbers<[1], [0], [0], [1], [0, 0, 1, 1], [], []>} : vector<8x64xf32>, vector<64x192xf32>, vector<8x192xf32> -> vector<8x192xf32>
    %325 = vector.extract_strided_slice %14 {offsets = [5, 0, 0], sizes = [1, 8, 96], strides = [1, 1, 1]} : vector<8x8x96xf32> to vector<1x8x96xf32>
    %326 = vector.shape_cast %325 : vector<1x8x96xf32> to vector<8x96xf32>
    %327 = vector.extract_strided_slice %20 {offsets = [2, 0, 0], sizes = [1, 8, 96], strides = [1, 1, 1]} : vector<8x8x96xf32> to vector<1x8x96xf32>
    %328 = vector.shape_cast %327 : vector<1x8x96xf32> to vector<8x96xf32>
    %329 = vector.extract_strided_slice %326 {offsets = [0, 0], sizes = [8, 32], strides = [1, 1]} : vector<8x96xf32> to vector<8x32xf32>
    %330 = vector.extract_strided_slice %324 {offsets = [0, 0], sizes = [8, 32], strides = [1, 1]} : vector<8x192xf32> to vector<8x32xf32>
    %331 = arith.addf %329, %330 : vector<8x32xf32>
    %332 = arith.negf %331 : vector<8x32xf32>
    %333 = math.exp %332 : vector<8x32xf32>
    %cst_54 = arith.constant 1.000000e+00 : f32
    %334 = vector.broadcast %cst_54 : f32 to vector<8x32xf32>
    %335 = arith.addf %334, %333 : vector<8x32xf32>
    %336 = arith.divf %334, %335 : vector<8x32xf32>
    %337 = vector.extract_strided_slice %326 {offsets = [0, 32], sizes = [8, 32], strides = [1, 1]} : vector<8x96xf32> to vector<8x32xf32>
    %338 = vector.extract_strided_slice %324 {offsets = [0, 32], sizes = [8, 32], strides = [1, 1]} : vector<8x192xf32> to vector<8x32xf32>
    %339 = arith.addf %337, %338 : vector<8x32xf32>
    %340 = arith.negf %339 : vector<8x32xf32>
    %341 = math.exp %340 : vector<8x32xf32>
    %cst_55 = arith.constant 1.000000e+00 : f32
    %342 = vector.broadcast %cst_55 : f32 to vector<8x32xf32>
    %343 = arith.addf %342, %341 : vector<8x32xf32>
    %344 = arith.divf %342, %343 : vector<8x32xf32>
    %345 = vector.extract_strided_slice %326 {offsets = [0, 64], sizes = [8, 32], strides = [1, 1]} : vector<8x96xf32> to vector<8x32xf32>
    %346 = vector.extract_strided_slice %324 {offsets = [0, 64], sizes = [8, 32], strides = [1, 1]} : vector<8x192xf32> to vector<8x32xf32>
    %347 = arith.addf %346, %3 : vector<8x32xf32>
    %348 = arith.mulf %336, %347 : vector<8x32xf32>
    %349 = arith.addf %345, %348 : vector<8x32xf32>
    %350 = math.tanh %349 : vector<8x32xf32>
    %cst_56 = arith.constant 1.000000e+00 : f32
    %351 = vector.broadcast %cst_56 : f32 to vector<8x32xf32>
    %352 = arith.subf %351, %344 : vector<8x32xf32>
    %353 = arith.mulf %352, %350 : vector<8x32xf32>
    %354 = arith.mulf %344, %295 : vector<8x32xf32>
    %355 = arith.addf %353, %354 : vector<8x32xf32>
    %356 = vector.extract_strided_slice %328 {offsets = [0, 0], sizes = [8, 32], strides = [1, 1]} : vector<8x96xf32> to vector<8x32xf32>
    %357 = vector.extract_strided_slice %324 {offsets = [0, 96], sizes = [8, 32], strides = [1, 1]} : vector<8x192xf32> to vector<8x32xf32>
    %358 = arith.addf %356, %357 : vector<8x32xf32>
    %359 = arith.negf %358 : vector<8x32xf32>
    %360 = math.exp %359 : vector<8x32xf32>
    %cst_57 = arith.constant 1.000000e+00 : f32
    %361 = vector.broadcast %cst_57 : f32 to vector<8x32xf32>
    %362 = arith.addf %361, %360 : vector<8x32xf32>
    %363 = arith.divf %361, %362 : vector<8x32xf32>
    %364 = vector.extract_strided_slice %328 {offsets = [0, 32], sizes = [8, 32], strides = [1, 1]} : vector<8x96xf32> to vector<8x32xf32>
    %365 = vector.extract_strided_slice %324 {offsets = [0, 128], sizes = [8, 32], strides = [1, 1]} : vector<8x192xf32> to vector<8x32xf32>
    %366 = arith.addf %364, %365 : vector<8x32xf32>
    %367 = arith.negf %366 : vector<8x32xf32>
    %368 = math.exp %367 : vector<8x32xf32>
    %cst_58 = arith.constant 1.000000e+00 : f32
    %369 = vector.broadcast %cst_58 : f32 to vector<8x32xf32>
    %370 = arith.addf %369, %368 : vector<8x32xf32>
    %371 = arith.divf %369, %370 : vector<8x32xf32>
    %372 = vector.extract_strided_slice %328 {offsets = [0, 64], sizes = [8, 32], strides = [1, 1]} : vector<8x96xf32> to vector<8x32xf32>
    %373 = vector.extract_strided_slice %324 {offsets = [0, 160], sizes = [8, 32], strides = [1, 1]} : vector<8x192xf32> to vector<8x32xf32>
    %374 = arith.addf %373, %6 : vector<8x32xf32>
    %375 = arith.mulf %363, %374 : vector<8x32xf32>
    %376 = arith.addf %372, %375 : vector<8x32xf32>
    %377 = math.tanh %376 : vector<8x32xf32>
    %cst_59 = arith.constant 1.000000e+00 : f32
    %378 = vector.broadcast %cst_59 : f32 to vector<8x32xf32>
    %379 = arith.subf %378, %371 : vector<8x32xf32>
    %380 = arith.mulf %379, %377 : vector<8x32xf32>
    %381 = arith.mulf %371, %322 : vector<8x32xf32>
    %382 = arith.addf %380, %381 : vector<8x32xf32>
    %383 = tpu.concatenate %355, %382 in 1 : vector<8x32xf32>, vector<8x32xf32> -> vector<8x64xf32>
    %cst_60 = arith.constant dense<0.000000e+00> : vector<8x192xf32>
    %384 = tpu.matmul %383, %0, %cst_60 {dimension_numbers = #tpu.dot_dimension_numbers<[1], [0], [0], [1], [0, 0, 1, 1], [], []>} : vector<8x64xf32>, vector<64x192xf32>, vector<8x192xf32> -> vector<8x192xf32>
    %385 = vector.extract_strided_slice %14 {offsets = [6, 0, 0], sizes = [1, 8, 96], strides = [1, 1, 1]} : vector<8x8x96xf32> to vector<1x8x96xf32>
    %386 = vector.shape_cast %385 : vector<1x8x96xf32> to vector<8x96xf32>
    %387 = vector.extract_strided_slice %20 {offsets = [1, 0, 0], sizes = [1, 8, 96], strides = [1, 1, 1]} : vector<8x8x96xf32> to vector<1x8x96xf32>
    %388 = vector.shape_cast %387 : vector<1x8x96xf32> to vector<8x96xf32>
    %389 = vector.extract_strided_slice %386 {offsets = [0, 0], sizes = [8, 32], strides = [1, 1]} : vector<8x96xf32> to vector<8x32xf32>
    %390 = vector.extract_strided_slice %384 {offsets = [0, 0], sizes = [8, 32], strides = [1, 1]} : vector<8x192xf32> to vector<8x32xf32>
    %391 = arith.addf %389, %390 : vector<8x32xf32>
    %392 = arith.negf %391 : vector<8x32xf32>
    %393 = math.exp %392 : vector<8x32xf32>
    %cst_61 = arith.constant 1.000000e+00 : f32
    %394 = vector.broadcast %cst_61 : f32 to vector<8x32xf32>
    %395 = arith.addf %394, %393 : vector<8x32xf32>
    %396 = arith.divf %394, %395 : vector<8x32xf32>
    %397 = vector.extract_strided_slice %386 {offsets = [0, 32], sizes = [8, 32], strides = [1, 1]} : vector<8x96xf32> to vector<8x32xf32>
    %398 = vector.extract_strided_slice %384 {offsets = [0, 32], sizes = [8, 32], strides = [1, 1]} : vector<8x192xf32> to vector<8x32xf32>
    %399 = arith.addf %397, %398 : vector<8x32xf32>
    %400 = arith.negf %399 : vector<8x32xf32>
    %401 = math.exp %400 : vector<8x32xf32>
    %cst_62 = arith.constant 1.000000e+00 : f32
    %402 = vector.broadcast %cst_62 : f32 to vector<8x32xf32>
    %403 = arith.addf %402, %401 : vector<8x32xf32>
    %404 = arith.divf %402, %403 : vector<8x32xf32>
    %405 = vector.extract_strided_slice %386 {offsets = [0, 64], sizes = [8, 32], strides = [1, 1]} : vector<8x96xf32> to vector<8x32xf32>
    %406 = vector.extract_strided_slice %384 {offsets = [0, 64], sizes = [8, 32], strides = [1, 1]} : vector<8x192xf32> to vector<8x32xf32>
    %407 = arith.addf %406, %3 : vector<8x32xf32>
    %408 = arith.mulf %396, %407 : vector<8x32xf32>
    %409 = arith.addf %405, %408 : vector<8x32xf32>
    %410 = math.tanh %409 : vector<8x32xf32>
    %cst_63 = arith.constant 1.000000e+00 : f32
    %411 = vector.broadcast %cst_63 : f32 to vector<8x32xf32>
    %412 = arith.subf %411, %404 : vector<8x32xf32>
    %413 = arith.mulf %412, %410 : vector<8x32xf32>
    %414 = arith.mulf %404, %355 : vector<8x32xf32>
    %415 = arith.addf %413, %414 : vector<8x32xf32>
    %416 = vector.extract_strided_slice %388 {offsets = [0, 0], sizes = [8, 32], strides = [1, 1]} : vector<8x96xf32> to vector<8x32xf32>
    %417 = vector.extract_strided_slice %384 {offsets = [0, 96], sizes = [8, 32], strides = [1, 1]} : vector<8x192xf32> to vector<8x32xf32>
    %418 = arith.addf %416, %417 : vector<8x32xf32>
    %419 = arith.negf %418 : vector<8x32xf32>
    %420 = math.exp %419 : vector<8x32xf32>
    %cst_64 = arith.constant 1.000000e+00 : f32
    %421 = vector.broadcast %cst_64 : f32 to vector<8x32xf32>
    %422 = arith.addf %421, %420 : vector<8x32xf32>
    %423 = arith.divf %421, %422 : vector<8x32xf32>
    %424 = vector.extract_strided_slice %388 {offsets = [0, 32], sizes = [8, 32], strides = [1, 1]} : vector<8x96xf32> to vector<8x32xf32>
    %425 = vector.extract_strided_slice %384 {offsets = [0, 128], sizes = [8, 32], strides = [1, 1]} : vector<8x192xf32> to vector<8x32xf32>
    %426 = arith.addf %424, %425 : vector<8x32xf32>
    %427 = arith.negf %426 : vector<8x32xf32>
    %428 = math.exp %427 : vector<8x32xf32>
    %cst_65 = arith.constant 1.000000e+00 : f32
    %429 = vector.broadcast %cst_65 : f32 to vector<8x32xf32>
    %430 = arith.addf %429, %428 : vector<8x32xf32>
    %431 = arith.divf %429, %430 : vector<8x32xf32>
    %432 = vector.extract_strided_slice %388 {offsets = [0, 64], sizes = [8, 32], strides = [1, 1]} : vector<8x96xf32> to vector<8x32xf32>
    %433 = vector.extract_strided_slice %384 {offsets = [0, 160], sizes = [8, 32], strides = [1, 1]} : vector<8x192xf32> to vector<8x32xf32>
    %434 = arith.addf %433, %6 : vector<8x32xf32>
    %435 = arith.mulf %423, %434 : vector<8x32xf32>
    %436 = arith.addf %432, %435 : vector<8x32xf32>
    %437 = math.tanh %436 : vector<8x32xf32>
    %cst_66 = arith.constant 1.000000e+00 : f32
    %438 = vector.broadcast %cst_66 : f32 to vector<8x32xf32>
    %439 = arith.subf %438, %431 : vector<8x32xf32>
    %440 = arith.mulf %439, %437 : vector<8x32xf32>
    %441 = arith.mulf %431, %382 : vector<8x32xf32>
    %442 = arith.addf %440, %441 : vector<8x32xf32>
    %443 = tpu.concatenate %415, %442 in 1 : vector<8x32xf32>, vector<8x32xf32> -> vector<8x64xf32>
    %cst_67 = arith.constant dense<0.000000e+00> : vector<8x192xf32>
    %444 = tpu.matmul %443, %0, %cst_67 {dimension_numbers = #tpu.dot_dimension_numbers<[1], [0], [0], [1], [0, 0, 1, 1], [], []>} : vector<8x64xf32>, vector<64x192xf32>, vector<8x192xf32> -> vector<8x192xf32>
    %445 = vector.extract_strided_slice %14 {offsets = [7, 0, 0], sizes = [1, 8, 96], strides = [1, 1, 1]} : vector<8x8x96xf32> to vector<1x8x96xf32>
    %446 = vector.shape_cast %445 : vector<1x8x96xf32> to vector<8x96xf32>
    %447 = vector.extract_strided_slice %20 {offsets = [0, 0, 0], sizes = [1, 8, 96], strides = [1, 1, 1]} : vector<8x8x96xf32> to vector<1x8x96xf32>
    %448 = vector.shape_cast %447 : vector<1x8x96xf32> to vector<8x96xf32>
    %449 = vector.extract_strided_slice %446 {offsets = [0, 0], sizes = [8, 32], strides = [1, 1]} : vector<8x96xf32> to vector<8x32xf32>
    %450 = vector.extract_strided_slice %444 {offsets = [0, 0], sizes = [8, 32], strides = [1, 1]} : vector<8x192xf32> to vector<8x32xf32>
    %451 = arith.addf %449, %450 : vector<8x32xf32>
    %452 = arith.negf %451 : vector<8x32xf32>
    %453 = math.exp %452 : vector<8x32xf32>
    %cst_68 = arith.constant 1.000000e+00 : f32
    %454 = vector.broadcast %cst_68 : f32 to vector<8x32xf32>
    %455 = arith.addf %454, %453 : vector<8x32xf32>
    %456 = arith.divf %454, %455 : vector<8x32xf32>
    %457 = vector.extract_strided_slice %446 {offsets = [0, 32], sizes = [8, 32], strides = [1, 1]} : vector<8x96xf32> to vector<8x32xf32>
    %458 = vector.extract_strided_slice %444 {offsets = [0, 32], sizes = [8, 32], strides = [1, 1]} : vector<8x192xf32> to vector<8x32xf32>
    %459 = arith.addf %457, %458 : vector<8x32xf32>
    %460 = arith.negf %459 : vector<8x32xf32>
    %461 = math.exp %460 : vector<8x32xf32>
    %cst_69 = arith.constant 1.000000e+00 : f32
    %462 = vector.broadcast %cst_69 : f32 to vector<8x32xf32>
    %463 = arith.addf %462, %461 : vector<8x32xf32>
    %464 = arith.divf %462, %463 : vector<8x32xf32>
    %465 = vector.extract_strided_slice %446 {offsets = [0, 64], sizes = [8, 32], strides = [1, 1]} : vector<8x96xf32> to vector<8x32xf32>
    %466 = vector.extract_strided_slice %444 {offsets = [0, 64], sizes = [8, 32], strides = [1, 1]} : vector<8x192xf32> to vector<8x32xf32>
    %467 = arith.addf %466, %3 : vector<8x32xf32>
    %468 = arith.mulf %456, %467 : vector<8x32xf32>
    %469 = arith.addf %465, %468 : vector<8x32xf32>
    %470 = math.tanh %469 : vector<8x32xf32>
    %cst_70 = arith.constant 1.000000e+00 : f32
    %471 = vector.broadcast %cst_70 : f32 to vector<8x32xf32>
    %472 = arith.subf %471, %464 : vector<8x32xf32>
    %473 = arith.mulf %472, %470 : vector<8x32xf32>
    %474 = arith.mulf %464, %415 : vector<8x32xf32>
    %475 = arith.addf %473, %474 : vector<8x32xf32>
    %476 = vector.extract_strided_slice %448 {offsets = [0, 0], sizes = [8, 32], strides = [1, 1]} : vector<8x96xf32> to vector<8x32xf32>
    %477 = vector.extract_strided_slice %444 {offsets = [0, 96], sizes = [8, 32], strides = [1, 1]} : vector<8x192xf32> to vector<8x32xf32>
    %478 = arith.addf %476, %477 : vector<8x32xf32>
    %479 = arith.negf %478 : vector<8x32xf32>
    %480 = math.exp %479 : vector<8x32xf32>
    %cst_71 = arith.constant 1.000000e+00 : f32
    %481 = vector.broadcast %cst_71 : f32 to vector<8x32xf32>
    %482 = arith.addf %481, %480 : vector<8x32xf32>
    %483 = arith.divf %481, %482 : vector<8x32xf32>
    %484 = vector.extract_strided_slice %448 {offsets = [0, 32], sizes = [8, 32], strides = [1, 1]} : vector<8x96xf32> to vector<8x32xf32>
    %485 = vector.extract_strided_slice %444 {offsets = [0, 128], sizes = [8, 32], strides = [1, 1]} : vector<8x192xf32> to vector<8x32xf32>
    %486 = arith.addf %484, %485 : vector<8x32xf32>
    %487 = arith.negf %486 : vector<8x32xf32>
    %488 = math.exp %487 : vector<8x32xf32>
    %cst_72 = arith.constant 1.000000e+00 : f32
    %489 = vector.broadcast %cst_72 : f32 to vector<8x32xf32>
    %490 = arith.addf %489, %488 : vector<8x32xf32>
    %491 = arith.divf %489, %490 : vector<8x32xf32>
    %492 = vector.extract_strided_slice %448 {offsets = [0, 64], sizes = [8, 32], strides = [1, 1]} : vector<8x96xf32> to vector<8x32xf32>
    %493 = vector.extract_strided_slice %444 {offsets = [0, 160], sizes = [8, 32], strides = [1, 1]} : vector<8x192xf32> to vector<8x32xf32>
    %494 = arith.addf %493, %6 : vector<8x32xf32>
    %495 = arith.mulf %483, %494 : vector<8x32xf32>
    %496 = arith.addf %492, %495 : vector<8x32xf32>
    %497 = math.tanh %496 : vector<8x32xf32>
    %cst_73 = arith.constant 1.000000e+00 : f32
    %498 = vector.broadcast %cst_73 : f32 to vector<8x32xf32>
    %499 = arith.subf %498, %491 : vector<8x32xf32>
    %500 = arith.mulf %499, %497 : vector<8x32xf32>
    %501 = arith.mulf %491, %442 : vector<8x32xf32>
    %502 = arith.addf %500, %501 : vector<8x32xf32>
    %503 = vector.shape_cast %55 : vector<8x32xf32> to vector<1x8x32xf32>
    %504 = vector.shape_cast %115 : vector<8x32xf32> to vector<1x8x32xf32>
    %505 = vector.shape_cast %175 : vector<8x32xf32> to vector<1x8x32xf32>
    %506 = vector.shape_cast %235 : vector<8x32xf32> to vector<1x8x32xf32>
    %507 = vector.shape_cast %295 : vector<8x32xf32> to vector<1x8x32xf32>
    %508 = vector.shape_cast %355 : vector<8x32xf32> to vector<1x8x32xf32>
    %509 = vector.shape_cast %415 : vector<8x32xf32> to vector<1x8x32xf32>
    %510 = vector.shape_cast %475 : vector<8x32xf32> to vector<1x8x32xf32>
    %511 = tpu.concatenate %503, %504, %505, %506, %507, %508, %509, %510 in 0 : vector<1x8x32xf32>, vector<1x8x32xf32>, vector<1x8x32xf32>, vector<1x8x32xf32>, vector<1x8x32xf32>, vector<1x8x32xf32>, vector<1x8x32xf32>, vector<1x8x32xf32> -> vector<8x8x32xf32>
    %512 = vector.shape_cast %502 : vector<8x32xf32> to vector<1x8x32xf32>
    %513 = vector.shape_cast %442 : vector<8x32xf32> to vector<1x8x32xf32>
    %514 = vector.shape_cast %382 : vector<8x32xf32> to vector<1x8x32xf32>
    %515 = vector.shape_cast %322 : vector<8x32xf32> to vector<1x8x32xf32>
    %516 = vector.shape_cast %262 : vector<8x32xf32> to vector<1x8x32xf32>
    %517 = vector.shape_cast %202 : vector<8x32xf32> to vector<1x8x32xf32>
    %518 = vector.shape_cast %142 : vector<8x32xf32> to vector<1x8x32xf32>
    %519 = vector.shape_cast %82 : vector<8x32xf32> to vector<1x8x32xf32>
    %520 = tpu.concatenate %512, %513, %514, %515, %516, %517, %518, %519 in 0 : vector<1x8x32xf32>, vector<1x8x32xf32>, vector<1x8x32xf32>, vector<1x8x32xf32>, vector<1x8x32xf32>, vector<1x8x32xf32>, vector<1x8x32xf32>, vector<1x8x32xf32> -> vector<8x8x32xf32>
    %521 = tpu.concatenate %511, %520 in 2 : vector<8x8x32xf32>, vector<8x8x32xf32> -> vector<8x8x64xf32>
    %c0_74 = arith.constant 0 : index
    %c0_75 = arith.constant 0 : index
    %c0_76 = arith.constant 0 : index
    %522 = vector.load %arg10[%c0_74, %c0_75, %c0_76] : memref<8x8x64xf32, #tpu.memory_space<vmem>>, vector<8x8x64xf32>
    tpu.vector_store %arg10[%c0_74, %c0_75, %c0_76], %521 {strides = array<i32>} : memref<8x8x64xf32, #tpu.memory_space<vmem>>, vector<8x8x64xf32>,
    %523 = tpu.concatenate %475, %502 in 1 : vector<8x32xf32>, vector<8x32xf32> -> vector<8x64xf32>
    %c0_77 = arith.constant 0 : index
    %c0_78 = arith.constant 0 : index
    %524 = vector.load %arg8[%c0_77, %c0_78] : memref<64x32xf32, #tpu.memory_space<vmem>>, vector<64x32xf32>
    %cst_79 = arith.constant dense<0.000000e+00> : vector<8x32xf32>
    %525 = tpu.matmul %523, %524, %cst_79 {dimension_numbers = #tpu.dot_dimension_numbers<[1], [0], [0], [1], [0, 0, 1, 1], [], []>} : vector<8x64xf32>, vector<64x32xf32>, vector<8x32xf32> -> vector<8x32xf32>
    %c0_80 = arith.constant 0 : index
    %c0_81 = arith.constant 0 : index
    %526 = vector.load %arg9[%c0_80, %c0_81] : memref<1x32xf32, #tpu.memory_space<vmem>>, vector<1x32xf32>
    %527 = vector.broadcast %526 : vector<1x32xf32> to vector<8x32xf32>
    %528 = arith.addf %525, %527 : vector<8x32xf32>
    %529 = math.tanh %528 : vector<8x32xf32>
    %c0_82 = arith.constant 0 : index
    %c0_83 = arith.constant 0 : index
    %530 = vector.load %arg11[%c0_82, %c0_83] : memref<8x32xf32, #tpu.memory_space<vmem>>, vector<8x32xf32>
    tpu.vector_store %arg11[%c0_82, %c0_83], %529 {strides = array<i32>} : memref<8x32xf32, #tpu.memory_space<vmem>>, vector<8x32xf32>,
    return
  }
  func.func @transform_0(%arg0: i32) -> (i32, i32, i32) {
    %c0_i32 = arith.constant 0 : i32
    %c0_i32_0 = arith.constant 0 : i32
    %c0_i32_1 = arith.constant 0 : i32
    return %c0_i32, %arg0, %c0_i32_0 : i32, i32, i32
  }
  func.func @transform_1(%arg0: i32) -> (i32, i32) {
    %c0_i32 = arith.constant 0 : i32
    %c0_i32_0 = arith.constant 0 : i32
    %c0_i32_1 = arith.constant 0 : i32
    return %c0_i32, %c0_i32_0 : i32, i32
  }
  func.func @transform_2(%arg0: i32) -> (i32, i32) {
    %c0_i32 = arith.constant 0 : i32
    %c0_i32_0 = arith.constant 0 : i32
    %c0_i32_1 = arith.constant 0 : i32
    return %c0_i32, %c0_i32_0 : i32, i32
  }
  func.func @transform_3(%arg0: i32) -> (i32, i32) {
    %c0_i32 = arith.constant 0 : i32
    %c0_i32_0 = arith.constant 0 : i32
    %c0_i32_1 = arith.constant 0 : i32
    return %c0_i32, %c0_i32_0 : i32, i32
  }
  func.func @transform_4(%arg0: i32) -> (i32, i32) {
    %c0_i32 = arith.constant 0 : i32
    %c0_i32_0 = arith.constant 0 : i32
    %c0_i32_1 = arith.constant 0 : i32
    return %c0_i32, %c0_i32_0 : i32, i32
  }
  func.func @transform_5(%arg0: i32) -> (i32, i32) {
    %c0_i32 = arith.constant 0 : i32
    %c0_i32_0 = arith.constant 0 : i32
    %c0_i32_1 = arith.constant 0 : i32
    return %c0_i32, %c0_i32_0 : i32, i32
  }
  func.func @transform_6(%arg0: i32) -> (i32, i32) {
    %c0_i32 = arith.constant 0 : i32
    %c0_i32_0 = arith.constant 0 : i32
    %c0_i32_1 = arith.constant 0 : i32
    return %c0_i32, %c0_i32_0 : i32, i32
  }
  func.func @transform_7(%arg0: i32) -> (i32, i32) {
    %c0_i32 = arith.constant 0 : i32
    %c0_i32_0 = arith.constant 0 : i32
    %c0_i32_1 = arith.constant 0 : i32
    return %c0_i32, %c0_i32_0 : i32, i32
  }
  func.func @transform_8(%arg0: i32) -> (i32, i32) {
    %c0_i32 = arith.constant 0 : i32
    %c0_i32_0 = arith.constant 0 : i32
    %c0_i32_1 = arith.constant 0 : i32
    return %c0_i32, %c0_i32_0 : i32, i32
  }
  func.func @transform_9(%arg0: i32) -> (i32, i32, i32) {
    %c0_i32 = arith.constant 0 : i32
    %c0_i32_0 = arith.constant 0 : i32
    %c0_i32_1 = arith.constant 0 : i32
    return %c0_i32, %arg0, %c0_i32_0 : i32, i32, i32
  }
  func.func @transform_10(%arg0: i32) -> (i32, i32) {
    %c0_i32 = arith.constant 0 : i32
    %c0_i32_0 = arith.constant 0 : i32
    return %arg0, %c0_i32 : i32, i32
  }
}

</mosaic_0001>

<bundles_post_ra>
// kernel: tpu_custom_call.1
= control target key start
LH: loop header
LB: loop body
LE: loop exit
PB: predicated region body
PF: predicated region fallthrough
CT: control target
= control target key end

     0   :  { %16 = vsyncpa [#allocation3], 0  ;;  %s2693_s0 = inlined_call_operand.vmem [shape: f32[8,8,32], index: 0, kind: input, shape index: {}]   ;;  %s2694_s1 = inlined_call_operand.vmem [shape: f32[32,96], index: 1, kind: input, shape index: {}]   ;;  %s2695_s2 = inlined_call_operand.hbm [shape: f32[32,96], index: 2, kind: input, shape index: {}]   ;;  %s2696_s3 = inlined_call_operand.vmem [shape: f32[1,96], index: 3, kind: input, shape index: {}]   ;;  %s2697_s4 = inlined_call_operand.vmem [shape: f32[1,96], index: 4, kind: input, shape index: {}]   ;;  %s2698_s5 = inlined_call_operand.hbm [shape: f32[64,192], index: 5, kind: input, shape index: {}]   ;;  %s2699_s6 = inlined_call_operand.vmem [shape: f32[1,64], index: 6, kind: input, shape index: {}]   ;;  %s2700_s7 = inlined_call_operand.vmem [shape: f32[64,32], index: 7, kind: input, shape index: {}]   ;;  %s2701_s8 = inlined_call_operand.vmem [shape: f32[1,32], index: 8, kind: input, shape index: {}]   ;;  %s2702_s9 = inlined_call_operand.hbm [shape: f32[8,8,64], index: 9, kind: output, shape index: {0}]   ;;  %s2703_s10 = inlined_call_operand.hbm [shape: f32[8,32], index: 10, kind: output, shape index: {1}]  }
   0x1   :  { %17 = vsyncpa [#allocation6], 0 }
   0x2   :  { %18 = vsyncpa [#allocation4], 0 }
   0x3   :  { %19 = vsyncpa [#allocation9], 0  ;;  %s2058_s13 = smov [#allocation2]  }
   0x4   :  { %s29_s14 = sshll.u32 %s2058_s13, 4  ;;  %s30_s14 = int_to_ptr.vmem [resolvable:$true] %s29_s14 }
   0x5   :  { %s1978_s15 = scalar_lea.vmem %s30_s14, 512  ;;  %p1983_p1 = scmp.lt.s32.totalorder %s30_s14, %s30_s14 }
   0x6   :  { %p1979_p0 = scmp.ne.s32.totalorder %s30_s14, %s1978_s15  ;;  %p1984_p2 = scmp.lt.s32.totalorder %s1978_s15, %s1978_s15 }
   0x8   :  { %p1985_p3 = por %p1984_p2, %p1983_p1 }
   0xa   :  { %p1986_p4 = pnand %p1985_p3, %p1979_p0 }
   0xc   :  { %1989 = shalt.err (!%p1986_p4)
}
   0xd   :  { %s2059_s16 = smov 128   ;;  %s2060_s17 = smov 8  }
   0xe   :  { %35 = dma.hbm_to_vmem [thread:$0]  %s2695_s2, 512, %s30_s14, [#allocation3], %s2059_s16, %s2059_s16, %s2060_s17  }
   0xf   :  { %s2061_s20 = smov [#allocation5]  }
  0x10   :  { %s45_s21 = sshll.u32 %s2061_s20, 4  ;;  %s46_s21 = int_to_ptr.vmem [resolvable:$true] %s45_s21 }
  0x11   :  { %s1998_s22 = scalar_lea.vmem %s46_s21, 2048  ;;  %p2003_p6 = scmp.lt.s32.totalorder %s46_s21, %s46_s21 }
  0x12   :  { %p1999_p5 = scmp.ne.s32.totalorder %s46_s21, %s1998_s22  ;;  %p2004_p7 = scmp.lt.s32.totalorder %s1998_s22, %s1998_s22 }
  0x14   :  { %p2005_p8 = por %p2004_p7, %p2003_p6 }
  0x16   :  { %p2006_p9 = pnand %p2005_p8, %p1999_p5 }
  0x18   :  { %2009 = shalt.err (!%p2006_p9)
}
  0x19   :  { %s2062_s23 = smov 256   ;;  %s2063_s24 = smov 16  }
  0x1a   :  { %51 = dma.hbm_to_vmem [thread:$0]  %s2698_s5, 2048, %s46_s21, [#allocation6], %s2062_s23, %s2062_s23, %s2063_s24  }
  0x1b   :  { %2050 = dma.done.wait [#allocation3], 512  }
  0x1c   :  { %2051 = vsyncadd [#allocation3], 4294966784 }
  0x1d   :  { %2052 = dma.done.wait [#allocation6], 2048  }
  0x1e   :  { %2053 = vsyncadd [#allocation6], 4294965248  ;;  %vm106_vm0 = vcmask 261120   ;;  %v98_v0 = vld [vmem:[%s2694_s1 + $0x18] sm:$0xff]  ;;  %v97_v1 = vld [vmem:[%s2694_s1 + $0x10] sm:$0xff]  ;;  %s2064_s26 = smov 64  }
  0x1f   :  { %1763 = vmatprep.subr.mxu0 %v98_v0  ;;  %v87_v2 = vld [vmem:[%s2693_s0] sm:$0xff]  ;;  %v96_v3 = vld [vmem:[%s2694_s1 + $0x8] sm:$0xff]  ;;  %v2157_v6 = vld [vmem:[#allocation5 + $0x78] sm:$0xff]  ;;  %v2065_v33 = vmov 0.0   ;;  %s2067_s14 = smov 96   ;;  %vm352_vm1 = vcmask 523264  }
  0x20   :  { %1764 = vmatpush3.msra.mxu0 %v98_v0  ;;  %1771 = vmatprep.mubr.msk.f32.mxu0 %vm106_vm0, %v87_v2  ;;  %v95_v4 = vld [vmem:[%s2694_s1] sm:$0xff]  ;;  %v2155_v5 = vld [vmem:[%s2693_s0 + $0x8] sm:$0xff]  ;;  %v2159_v7 = vld [vmem:[#allocation5 + $0x70] sm:$0xff]  ;;  %vm2068_vm2 = vmmov 0  }
  0x21   :  { %1765 = vmatprep.subr.mxu0 %v97_v1  ;;  %1791 = vmatprep.mubr.msk.f32.mxu1 %vm106_vm0, %v87_v2  ;;  %v2164_v8 = vld [vmem:[%s2693_s0 + $0x10] sm:$0xff]  ;;  %v2166_v9 = vld [vmem:[#allocation5 + $0x68] sm:$0xff]  ;;  %v2171_v10 = vld [vmem:[#allocation5 + $0x60] sm:$0xff] }
  0x22   :  { %1766 = vmatpush3.msra.mxu0 %v97_v1  ;;  %v2176_v11 = vld [vmem:[%s2699_s6] ss:$0 sm:$0xff]  ;;  %v239_v12 = vld [vmem:[#allocation2 + $0x18] sm:$0xff]  ;;  %v2187_v15 = vld [vmem:[#allocation5 + $0x50] sm:$0xff] }
  0x23   :  { %1767 = vmatprep.subr.mxu0 %v96_v3  ;;  %v90_v13 = vld [vmem:[%s2693_s0 + $0x18] sm:$0xff]  ;;  %v91_v16 = vld [vmem:[%s2693_s0 + $0x20] sm:$0xff]  ;;  %434 = vrot.lane.b32.xlu0 %v2176_v11, %s2064_s26  ;;  %v2195_v17 = vld [vmem:[#allocation5 + $0x48] sm:$0xff] }
  0x24   :  { %1768 = vmatpush3.msra.mxu0 %v96_v3  ;;  %v2184_v14 = vld [vmem:[#allocation5 + $0x58] sm:$0xff]  ;;  %1783 = vmatprep.subr.mxu1 %v239_v12  ;;  %v2199_v18 = vld [vmem:[#allocation5 + $0x40] sm:$0xff]  ;;  %v238_v19 = vld [vmem:[#allocation2 + $0x10] sm:$0xff] }
  0x25   :  { %1769 = vmatprep.subr.mxu0 %v95_v4  ;;  %v92_v20 = vld [vmem:[%s2693_s0 + $0x28] sm:$0xff]  ;;  %v2206_v21 = vld [vmem:[#allocation5 + $0x38] sm:$0xff]  ;;  %v2209_v22 = vld [vmem:[#allocation5 + $0x30] sm:$0xff]  ;;  %1784 = vmatpush3.msra.mxu1 %v239_v12 }
  0x26   :  { %1770 = vmatpush3.msra.mxu0 %v95_v4  ;;  %v93_v23 = vld [vmem:[%s2693_s0 + $0x30] sm:$0xff]  ;;  %v2215_v24 = vld [vmem:[#allocation5 + $0x28] sm:$0xff]  ;;  %1785 = vmatprep.subr.mxu1 %v238_v19  ;;  %v2219_v25 = vld [vmem:[#allocation5 + $0x20] sm:$0xff] }
  0x27   :  { %1772 = vmatmul.mubr.msk.f32.vlgmr.msra.gmra.mxu0 %vm106_vm0, %v2155_v5  ;;  %372 = vmatprep.subr.mxu0 %v2157_v6  ;;  %v237_v26 = vld [vmem:[#allocation2 + $0x8] sm:$0xff]  ;;  %v94_v27 = vld [vmem:[%s2693_s0 + $0x38] sm:$0xff]  ;;  %v2229_v29 = vld [vmem:[#allocation5 + $0x10] sm:$0xff] }
  0x28   :  { %373 = vmatpush1.msra.mxu0 %v2159_v7  ;;  %1774 = vmatprep.mubr.msk.f32.mxu0 %vm106_vm0, %v2164_v8  ;;  %v2226_v28 = vld [vmem:[#allocation5 + $0x18] sm:$0xff]  ;;  %v2232_v30 = vld [vmem:[#allocation5 + $0x8] sm:$0xff]  ;;  %v2236_v31 = vld [vmem:[#allocation5] sm:$0xff] }
  0x29   :  { %374 = vmatprep.subr.mxu0 %v2166_v9  ;;  %1786 = vmatpush3.msra.mxu1 %v238_v19  ;;  %v236_v32 = vld [vmem:[#allocation2] sm:$0xff] }
  0x2a   :  { %375 = vmatpush1.msra.mxu0 %v2171_v10  ;;  %1787 = vmatprep.subr.mxu1 %v237_v26  ;;  %v1679_v34 = vld [vmem:[%s2696_s3] ss:$0 sm:$0xff]  ;;  %s2066_s3 = smov 32  }
  0x2b   :  { %1775 = vmatmul.mubr.msk.f32.gmra.mxu0 %vm106_vm0, %v90_v13  ;;  %376 = vmatprep.subr.mxu0 %v2184_v14  ;;  %v2312_v54 = vld [vmem:[%s2697_s4] ss:$0 sm:$0xff] }
  0x2c   :  { %377 = vmatpush1.msra.mxu0 %v2187_v15  ;;  %1777 = vmatprep.mubr.msk.f32.mxu0 %vm106_vm0, %v91_v16 }
  0x2d   :  { %378 = vmatprep.subr.mxu0 %v2195_v17  ;;  %1788 = vmatpush3.msra.mxu1 %v237_v26 }
  0x2e   :  { %379 = vmatpush1.msra.mxu0 %v2199_v18  ;;  %1789 = vmatprep.subr.mxu1 %v236_v32 }
  0x2f   :  { %1778 = vmatmul.mubr.msk.f32.gmra.mxu0 %vm106_vm0, %v92_v20  ;;  %380 = vmatprep.subr.mxu0 %v2206_v21 }
  0x30   :  { %381 = vmatpush1.msra.mxu0 %v2209_v22  ;;  %1780 = vmatprep.mubr.msk.f32.mxu0 %vm106_vm0, %v93_v23 }
  0x31   :  { %382 = vmatprep.subr.mxu0 %v2215_v24  ;;  %1790 = vmatpush3.msra.mxu1 %v236_v32 }
  0x32   :  { %383 = vmatpush1.msra.mxu0 %v2219_v25  ;;  %1792 = vmatmul.mubr.msk.f32.vlgmr.msra.gmra.mxu1 %vm106_vm0, %v2155_v5 }
  0x33   :  { %1781 = vmatmul.mubr.msk.f32.gmra.mxu0 %vm106_vm0, %v94_v27  ;;  %384 = vmatprep.subr.mxu0 %v2226_v28 }
  0x34   :  { %385 = vmatpush1.msra.mxu0 %v2229_v29  ;;  %420 = vmatprep.mubr.f32.mxu0 %v2065_v33 }
  0x35   :  { %386 = vmatprep.subr.mxu0 %v2232_v30  ;;  %523 = vmatprep.subr.mxu1 %v2157_v6 }
  0x36   :  { %387 = vmatpush1.msra.mxu0 %v2236_v31  ;;  %1794 = vmatprep.mubr.msk.f32.mxu1 %vm106_vm0, %v2164_v8 }
  0x37   :  { %421 = vmatmul.mubr.f32.vlgmr.msra.gmra.mxu0 %v2065_v33  ;;  %524 = vmatpush1.msra.mxu1 %v2159_v7 }
  0x38   :  { %525 = vmatprep.subr.mxu1 %v2166_v9  ;;  %671 = vmatprep.subr.mxu0 %v2157_v6 }
  0x39   :  { %526 = vmatpush1.msra.mxu1 %v2171_v10  ;;  %672 = vmatpush1.msra.mxu0 %v2159_v7 }
  0x3a   :  { %1795 = vmatmul.mubr.msk.f32.gmra.mxu1 %vm106_vm0, %v90_v13  ;;  %527 = vmatprep.subr.mxu1 %v2184_v14 }
  0x3b   :  { %1797 = vmatprep.mubr.msk.f32.mxu1 %vm106_vm0, %v91_v16  ;;  %528 = vmatpush1.msra.mxu1 %v2187_v15 }
  0x3c   :  { %529 = vmatprep.subr.mxu1 %v2195_v17  ;;  %673 = vmatprep.subr.mxu0 %v2166_v9 }
  0x3d   :  { %530 = vmatpush1.msra.mxu1 %v2199_v18  ;;  %674 = vmatpush1.msra.mxu0 %v2171_v10 }
  0x3e   :  { %1798 = vmatmul.mubr.msk.f32.gmra.mxu1 %vm106_vm0, %v92_v20  ;;  %531 = vmatprep.subr.mxu1 %v2206_v21 }
  0x3f   :  { %1800 = vmatprep.mubr.msk.f32.mxu1 %vm106_vm0, %v93_v23  ;;  %532 = vmatpush1.msra.mxu1 %v2209_v22 }
  0x40   :  { %533 = vmatprep.subr.mxu1 %v2215_v24  ;;  %675 = vmatprep.subr.mxu0 %v2184_v14 }
  0x41   :  { %534 = vmatpush1.msra.mxu1 %v2219_v25  ;;  %676 = vmatpush1.msra.mxu0 %v2187_v15 }
  0x42   :  { %1801 = vmatmul.mubr.msk.f32.gmra.mxu1 %vm106_vm0, %v94_v27  ;;  %535 = vmatprep.subr.mxu1 %v2226_v28 }
  0x43   :  { %536 = vmatpush1.msra.mxu1 %v2229_v29  ;;  %571 = vmatprep.mubr.f32.mxu1 %v2065_v33 }
  0x44   :  { %537 = vmatprep.subr.mxu1 %v2232_v30  ;;  %677 = vmatprep.subr.mxu0 %v2195_v17 }
  0x45   :  { %538 = vmatpush1.msra.mxu1 %v2236_v31  ;;  %678 = vmatpush1.msra.mxu0 %v2199_v18 }
  0x46   :  { %679 = vmatprep.subr.mxu0 %v2206_v21  ;;  %719 = vmatprep.mubr.f32.mxu0 %v2065_v33 }
  0x47   :  { %680 = vmatpush1.msra.mxu0 %v2209_v22  ;;  %819 = vmatprep.subr.mxu1 %v2157_v6 }
  0x48   :  { %681 = vmatprep.subr.mxu0 %v2215_v24 }
  0x49   :  { %682 = vmatpush1.msra.mxu0 %v2219_v25 }
  0x4a   :  { %683 = vmatprep.subr.mxu0 %v2226_v28 }
  0x4b   :  { %684 = vmatpush1.msra.mxu0 %v2229_v29 }
  0x4c   :  { %685 = vmatprep.subr.mxu0 %v2232_v30 }
  0x4d   :  { %686 = vmatpush1.msra.mxu0 %v2236_v31 }
  0x4e   :  { %967 = vmatprep.subr.mxu0 %v2157_v6 }
  0x95   :  { %v2303_v49 = vpop.permute.xlu0 %434 }
  0xe7   :  { %v1773_v35 = vpop.f32.mrf.mxu0 }
  0xe8   :  { %v2291_v36 = vadd.f32 %v1773_v35, %v1679_v34 }
  0xe9   :  { %v197_v37 = vpop.f32.mrf.mxu0 }
  0xea   :  { %v198_v4 = vadd.f32 %v1679_v34, %v197_v37 }
  0xeb   :  { %v1776_v38 = vpop.f32.mrf.mxu0 }
  0xec   :  { %v2293_v39 = vadd.f32 %v1776_v38, %v1679_v34 }
  0xed   :  { %v207_v40 = vpop.f32.mrf.mxu0 }
  0xee   :  { %v2295_v41 = vadd.f32 %v1679_v34, %v207_v40 }
  0xef   :  { %v1779_v42 = vpop.f32.mrf.mxu0 }
  0xf0   :  { %v2297_v43 = vadd.f32 %v1779_v42, %v1679_v34 }
  0xf1   :  { %v217_v44 = vpop.f32.mrf.mxu0 }
  0xf2   :  { %v2299_v45 = vadd.f32 %v1679_v34, %v217_v44  ;;  %v1793_v53 = vpop.f32.mrf.mxu1 }
  0xf3   :  { %v1782_v46 = vpop.f32.mrf.mxu0  ;;  %v2315_v56 = vadd.f32 %v1793_v53, %v2312_v54 }
  0xf4   :  { %v2301_v47 = vadd.f32 %v1782_v46, %v1679_v34  ;;  %v313_v58 = vpop.f32.mrf.mxu1 }
  0xf5   :  { %v227_v48 = vpop.f32.mrf.mxu0  ;;  %v2320_v59 = vadd.f32 %v2312_v54, %v313_v58 }
  0xf6   :  { %v2305_v50 = vadd.f32 %v1679_v34, %v227_v48 }
  0xf7   :  { %v422_v51 = vpop.f32.mrf.mxu0 }
  0xf8   :  { %v437_v52 = vadd.f32 %v2303_v49, %v422_v51  ;;  %458 = vrot.lane.b32.xlu1 %v422_v51, %s2066_s3  ;;  %v427_v5 = vadd.f32 %v422_v51, %v198_v4 }
  0xf9   :  { %v424_v55 = vpop.f32.mrf.mxu0 }
  0xfa   :  { %v479_v57 = vadd.f32 %v2176_v11, %v424_v55  ;;  %439 = vrot.lane.b32.xlu0 %v437_v52, %s2064_s26  ;;  %v1796_v60 = vpop.f32.mrf.mxu1  ;;  %v1697_v8 = vmul.f32 -1.442695, %v427_v5 }
  0xfb   :  { %v2324_v61 = vadd.f32 %v1796_v60, %v2312_v54 }
  0xfc   :  { %481 = vrot.lane.b32.xlu1 %v479_v57, %s2067_s14  ;;  %v323_v62 = vpop.f32.mrf.mxu1  ;;  %1835 = vpow2.f32 %v1697_v8 }
  0xfd   :  { %v2327_v63 = vadd.f32 %v2312_v54, %v323_v62 }
  0xfe   :  { %v1799_v0 = vpop.f32.mrf.mxu1 }
  0xff   :  { %v2330_v1 = vadd.f32 %v1799_v0, %v2312_v54 }
 0x100   :  { %v333_v2 = vpop.f32.mrf.mxu1 }
 0x101   :  { %v2333_v3 = vadd.f32 %v2312_v54, %v333_v2 }
 0x102   :  { %v1802_v16 = vpop.f32.mrf.mxu1 }
 0x103   :  { %v349_v19 = vadd.f32 %v1802_v16, %v2312_v54 }
 0x109   :  { %v1836_v12 = vpop.eup %1835 }
 0x10a   :  { %v431_v13 = vadd.f32 1.0, %v1836_v12 }
 0x10c   :  { %1837 = vrcp.f32 %v431_v13 }
 0x119   :  { %v1838_v26 = vpop.eup %1837 }
 0x11a   :  { %v449_v57 = vsub.f32 1.0, %v1838_v26  ;;  %v455_v60 = vmul.f32 0.0, %v1838_v26 }
 0x16a   :  { %v459_v20 = vpop.permute.xlu1 %458 }
 0x16b   :  { %v461_v23 = vadd.f32 %v459_v20, %v349_v19 }
 0x16c   :  { %v440_v27 = vpop.permute.xlu0 %439 }
 0x16d   :  { %v1698_v32 = vmul.f32 -1.442695, %v461_v23  ;;  %v442_v35 = vmul.f32 %v1838_v26, %v440_v27 }
 0x16e   :  { %v482_v40 = vpop.permute.xlu1 %481 }
 0x16f   :  { %1839 = vpow2.f32 %v1698_v32  ;;  %444 = vrot.lane.b32.xlu0 %v442_v35, %s2064_s26 }
 0x17c   :  { %v1840_v38 = vpop.eup %1839 }
 0x17d   :  { %v465_v34 = vadd.f32 1.0, %v1840_v38 }
 0x17f   :  { %1841 = vrcp.f32 %v465_v34 }
 0x18c   :  { %v1842_v37 = vpop.eup %1841 }
 0x18d   :  { %v484_v42 = vmul.f32 %v1842_v37, %v482_v40 }
 0x18f   :  { %486 = vrot.lane.b32.xlu1 %v484_v42, %s2064_s26 }
 0x193   :  { %469 = vrot.lane.b32.xlu1 %v424_v55, %s2066_s3 }
 0x1e1   :  { %v445_v44 = vpop.permute.xlu0 %444 }
 0x1e2   :  { %v447_v46 = vadd.f32 %v445_v44, %v198_v4 }
 0x1e4   :  { %1843 = vtanh.f32 %v447_v46 }
 0x1f1   :  { %v1844_v48 = vpop.eup %1843 }
 0x1f2   :  { %451 = vrot.lane.b32.xlu0 %v1844_v48, %s2067_s14 }
 0x201   :  { %v487_v51 = vpop.permute.xlu1 %486 }
 0x202   :  { %v489_v52 = vadd.f32 %v487_v51, %v349_v19 }
 0x204   :  { %1845 = vtanh.f32 %v489_v52 }
 0x205   :  { %v470_v55 = vpop.permute.xlu1 %469 }
 0x206   :  { %v472_v2 = vadd.f32 %v470_v55, %v349_v19  ;;  %v343_v19 = vpop.f32.mrf.mxu1 }
 0x207   :  { %v344_v48 = vadd.f32 %v2312_v54, %v343_v19 }
 0x208   :  { %v1699_v4 = vmul.f32 -1.442695, %v472_v2 }
 0x20a   :  { %1847 = vpow2.f32 %v1699_v4 }
 0x211   :  { %v1846_v53 = vpop.eup %1845 }
 0x212   :  { %493 = vrot.lane.b32.xlu0 %v1846_v53, %s2067_s14 }
 0x217   :  { %v1848_v5 = vpop.eup %1847 }
 0x218   :  { %v476_v8 = vadd.f32 1.0, %v1848_v5 }
 0x21a   :  { %1849 = vrcp.f32 %v476_v8 }
 0x227   :  { %v1850_v12 = vpop.eup %1849 }
 0x228   :  { %v491_v16 = vsub.f32 1.0, %v1850_v12  ;;  %v497_v23 = vmul.f32 0.0, %v1850_v12 }
 0x264   :  { %v452_v58 = vpop.permute.xlu0 %451 }
 0x265   :  { %v454_v62 = vmul.f32 %v452_v58, %v449_v57 }
 0x267   :  { %v2341_v0 = vadd.f32 %v455_v60, %v454_v62 }
 0x269   :  { %500 = vrot.lane.b32.xlu1 %v2341_v0, %s2067_s14 }
 0x284   :  { %v494_v13 = vpop.permute.xlu0 %493 }
 0x285   :  { %v496_v20 = vmul.f32 %v494_v13, %v491_v16 }
 0x287   :  { %v2345_v27 = vadd.f32 %v497_v23, %v496_v20 }
 0x2db   :  { %v2347_v26 = vpop.permute.xlu1 %500 }
 0x2dc   :  { %v503_v32 = vsel %vm106_vm0, %v2347_v26, %v2345_v27 }
 0x2dd   :  { %1700 = vmatmul.mubr.msk.f32.vlgmr.msra.gmra.mxu1 %vm352_vm1, %v503_v32 }
 0x2de   :  { %820 = vmatpush1.msra.mxu1 %v2159_v7  ;;  %867 = vmatprep.mubr.f32.mxu1 %v2065_v33 }
 0x2df   :  { %821 = vmatprep.subr.mxu1 %v2166_v9 }
 0x2e0   :  { %822 = vmatpush1.msra.mxu1 %v2171_v10 }
 0x2e1   :  { %823 = vmatprep.subr.mxu1 %v2184_v14 }
 0x2e2   :  { %824 = vmatpush1.msra.mxu1 %v2187_v15 }
 0x2e3   :  { %825 = vmatprep.subr.mxu1 %v2195_v17 }
 0x2e4   :  { %826 = vmatpush1.msra.mxu1 %v2199_v18 }
 0x2e5   :  { %827 = vmatprep.subr.mxu1 %v2206_v21 }
 0x2e6   :  { %828 = vmatpush1.msra.mxu1 %v2209_v22 }
 0x2e7   :  { %829 = vmatprep.subr.mxu1 %v2215_v24 }
 0x2e8   :  { %830 = vmatpush1.msra.mxu1 %v2219_v25 }
 0x2e9   :  { %831 = vmatprep.subr.mxu1 %v2226_v28 }
 0x2ea   :  { %832 = vmatpush1.msra.mxu1 %v2229_v29 }
 0x2eb   :  { %833 = vmatprep.subr.mxu1 %v2232_v30 }
 0x2ec   :  { %834 = vmatpush1.msra.mxu1 %v2236_v31 }
 0x2ed   :  { %1115 = vmatprep.subr.mxu1 %v2157_v6 }
 0x39d   :  { %v573_v35 = vpop.f32.mrf.mxu1 }
 0x39e   :  { %v585_v38 = vadd.f32 %v573_v35, %v2303_v49  ;;  %606 = vrot.lane.b32.xlu1 %v573_v35, %s2066_s3  ;;  %v578_v40 = vadd.f32 %v573_v35, %v2291_v36 }
 0x39f   :  { %v575_v34 = vpop.f32.mrf.mxu1 }
 0x3a0   :  { %587 = vrot.lane.b32.xlu0 %v585_v38, %s2064_s26  ;;  %v627_v37 = vadd.f32 %v2176_v11, %v575_v34  ;;  %v1701_v42 = vmul.f32 -1.442695, %v578_v40 }
 0x3a2   :  { %1851 = vpow2.f32 %v1701_v42 }
 0x3a4   :  { %629 = vrot.lane.b32.xlu0 %v627_v37, %s2067_s14 }
 0x3af   :  { %v1852_v44 = vpop.eup %1851 }
 0x3b0   :  { %v582_v46 = vadd.f32 1.0, %v1852_v44 }
 0x3b2   :  { %1853 = vrcp.f32 %v582_v46 }
 0x3bf   :  { %v1854_v53 = vpop.eup %1853 }
 0x3c0   :  { %v597_v23 = vsub.f32 1.0, %v1854_v53  ;;  %v603_v19 = vmul.f32 %v1854_v53, %v2341_v0 }
 0x410   :  { %v607_v51 = vpop.permute.xlu1 %606 }
 0x411   :  { %v609_v52 = vadd.f32 %v607_v51, %v344_v48 }
 0x412   :  { %v588_v57 = vpop.permute.xlu0 %587 }
 0x413   :  { %v1702_v58 = vmul.f32 -1.442695, %v609_v52  ;;  %v590_v60 = vmul.f32 %v1854_v53, %v588_v57 }
 0x415   :  { %1855 = vpow2.f32 %v1702_v58  ;;  %592 = vrot.lane.b32.xlu1 %v590_v60, %s2064_s26 }
 0x416   :  { %v630_v4 = vpop.permute.xlu0 %629 }
 0x422   :  { %v1856_v62 = vpop.eup %1855 }
 0x423   :  { %v613_v55 = vadd.f32 1.0, %v1856_v62 }
 0x425   :  { %1857 = vrcp.f32 %v613_v55 }
 0x432   :  { %v1858_v2 = vpop.eup %1857 }
 0x433   :  { %v632_v5 = vmul.f32 %v1858_v2, %v630_v4 }
 0x435   :  { %634 = vrot.lane.b32.xlu0 %v632_v5, %s2064_s26 }
 0x439   :  { %617 = vrot.lane.b32.xlu0 %v575_v34, %s2066_s3 }
 0x487   :  { %v593_v54 = vpop.permute.xlu1 %592 }
 0x488   :  { %v595_v8 = vadd.f32 %v593_v54, %v2291_v36 }
 0x48a   :  { %1859 = vtanh.f32 %v595_v8 }
 0x497   :  { %v1860_v12 = vpop.eup %1859 }
 0x498   :  { %599 = vrot.lane.b32.xlu1 %v1860_v12, %s2067_s14 }
 0x4a7   :  { %v635_v13 = vpop.permute.xlu0 %634 }
 0x4a8   :  { %v637_v16 = vadd.f32 %v635_v13, %v344_v48 }
 0x4aa   :  { %1861 = vtanh.f32 %v637_v16 }
 0x4ab   :  { %v618_v36 = vpop.permute.xlu0 %617 }
 0x4ac   :  { %v620_v34 = vadd.f32 %v618_v36, %v344_v48 }
 0x4ae   :  { %v1703_v37 = vmul.f32 -1.442695, %v620_v34 }
 0x4b0   :  { %1863 = vpow2.f32 %v1703_v37 }
 0x4b7   :  { %v1862_v20 = vpop.eup %1861 }
 0x4b8   :  { %641 = vrot.lane.b32.xlu1 %v1862_v20, %s2067_s14 }
 0x4bd   :  { %v1864_v40 = vpop.eup %1863 }
 0x4be   :  { %v624_v42 = vadd.f32 1.0, %v1864_v40 }
 0x4c0   :  { %1865 = vrcp.f32 %v624_v42 }
 0x4cd   :  { %v1866_v44 = vpop.eup %1865 }
 0x4ce   :  { %v639_v51 = vsub.f32 1.0, %v1866_v44  ;;  %v645_v57 = vmul.f32 %v1866_v44, %v2345_v27 }
 0x50a   :  { %v600_v32 = vpop.permute.xlu1 %599 }
 0x50b   :  { %v602_v35 = vmul.f32 %v600_v32, %v597_v23 }
 0x50d   :  { %v2384_v38 = vadd.f32 %v603_v19, %v602_v35 }
 0x50f   :  { %648 = vrot.lane.b32.xlu0 %v2384_v38, %s2067_s14 }
 0x52a   :  { %v642_v46 = vpop.permute.xlu1 %641 }
 0x52b   :  { %v644_v52 = vmul.f32 %v642_v46, %v639_v51 }
 0x52d   :  { %v2389_v0 = vadd.f32 %v645_v57, %v644_v52 }
 0x581   :  { %v2391_v53 = vpop.permute.xlu0 %648 }
 0x582   :  { %v651_v58 = vsel %vm106_vm0, %v2391_v53, %v2389_v0 }
 0x583   :  { %1704 = vmatmul.mubr.msk.f32.vlgmr.msra.gmra.mxu0 %vm352_vm1, %v651_v58 }
 0x584   :  { %968 = vmatpush1.msra.mxu0 %v2159_v7  ;;  %1015 = vmatprep.mubr.f32.mxu0 %v2065_v33 }
 0x585   :  { %969 = vmatprep.subr.mxu0 %v2166_v9 }
 0x586   :  { %970 = vmatpush1.msra.mxu0 %v2171_v10 }
 0x587   :  { %971 = vmatprep.subr.mxu0 %v2184_v14 }
 0x588   :  { %972 = vmatpush1.msra.mxu0 %v2187_v15 }
 0x589   :  { %973 = vmatprep.subr.mxu0 %v2195_v17 }
 0x58a   :  { %974 = vmatpush1.msra.mxu0 %v2199_v18 }
 0x58b   :  { %975 = vmatprep.subr.mxu0 %v2206_v21 }
 0x58c   :  { %976 = vmatpush1.msra.mxu0 %v2209_v22 }
 0x58d   :  { %977 = vmatprep.subr.mxu0 %v2215_v24 }
 0x58e   :  { %978 = vmatpush1.msra.mxu0 %v2219_v25 }
 0x58f   :  { %979 = vmatprep.subr.mxu0 %v2226_v28 }
 0x590   :  { %980 = vmatpush1.msra.mxu0 %v2229_v29 }
 0x591   :  { %981 = vmatprep.subr.mxu0 %v2232_v30 }
 0x592   :  { %982 = vmatpush1.msra.mxu0 %v2236_v31 }
 0x593   :  { %1263 = vmatprep.subr.mxu0 %v2157_v6 }
 0x643   :  { %v721_v48 = vpop.f32.mrf.mxu0 }
 0x644   :  { %v733_v60 = vadd.f32 %v721_v48, %v2303_v49  ;;  %754 = vrot.lane.b32.xlu0 %v721_v48, %s2066_s3  ;;  %v726_v2 = vadd.f32 %v721_v48, %v2295_v41 }
 0x645   :  { %v723_v62 = vpop.f32.mrf.mxu0 }
 0x646   :  { %735 = vrot.lane.b32.xlu1 %v733_v60, %s2064_s26  ;;  %v775_v55 = vadd.f32 %v2176_v11, %v723_v62  ;;  %v1705_v4 = vmul.f32 -1.442695, %v726_v2 }
 0x648   :  { %1867 = vpow2.f32 %v1705_v4 }
 0x64a   :  { %777 = vrot.lane.b32.xlu1 %v775_v55, %s2067_s14 }
 0x655   :  { %v1868_v5 = vpop.eup %1867 }
 0x656   :  { %v730_v54 = vadd.f32 1.0, %v1868_v5 }
 0x658   :  { %1869 = vrcp.f32 %v730_v54 }
 0x665   :  { %v1870_v13 = vpop.eup %1869 }
 0x666   :  { %v745_v52 = vsub.f32 1.0, %v1870_v13  ;;  %v751_v58 = vmul.f32 %v1870_v13, %v2384_v38 }
 0x6b6   :  { %v755_v8 = vpop.permute.xlu0 %754 }
 0x6b7   :  { %v757_v12 = vadd.f32 %v755_v8, %v2330_v1 }
 0x6b8   :  { %v736_v16 = vpop.permute.xlu1 %735 }
 0x6b9   :  { %v1706_v20 = vmul.f32 -1.442695, %v757_v12  ;;  %v738_v23 = vmul.f32 %v1870_v13, %v736_v16 }
 0x6bb   :  { %1871 = vpow2.f32 %v1706_v20  ;;  %740 = vrot.lane.b32.xlu0 %v738_v23, %s2064_s26 }
 0x6bc   :  { %v778_v36 = vpop.permute.xlu1 %777 }
 0x6c8   :  { %v1872_v32 = vpop.eup %1871 }
 0x6c9   :  { %v761_v19 = vadd.f32 1.0, %v1872_v32 }
 0x6cb   :  { %1873 = vrcp.f32 %v761_v19 }
 0x6d8   :  { %v1874_v35 = vpop.eup %1873 }
 0x6d9   :  { %v780_v34 = vmul.f32 %v1874_v35, %v778_v36 }
 0x6db   :  { %782 = vrot.lane.b32.xlu1 %v780_v34, %s2064_s26 }
 0x6df   :  { %765 = vrot.lane.b32.xlu1 %v723_v62, %s2066_s3 }
 0x72d   :  { %v741_v37 = vpop.permute.xlu0 %740 }
 0x72e   :  { %v743_v40 = vadd.f32 %v741_v37, %v2295_v41 }
 0x730   :  { %1875 = vtanh.f32 %v743_v40 }
 0x73d   :  { %v1876_v42 = vpop.eup %1875 }
 0x73e   :  { %747 = vrot.lane.b32.xlu0 %v1876_v42, %s2067_s14 }
 0x74d   :  { %v783_v44 = vpop.permute.xlu1 %782 }
 0x74e   :  { %v785_v46 = vadd.f32 %v783_v44, %v2330_v1 }
 0x750   :  { %1877 = vtanh.f32 %v785_v46 }
 0x751   :  { %v766_v41 = vpop.permute.xlu1 %765 }
 0x752   :  { %v768_v62 = vadd.f32 %v766_v41, %v2330_v1 }
 0x754   :  { %v1707_v55 = vmul.f32 -1.442695, %v768_v62 }
 0x756   :  { %1879 = vpow2.f32 %v1707_v55 }
 0x75d   :  { %v1878_v51 = vpop.eup %1877 }
 0x75e   :  { %789 = vrot.lane.b32.xlu0 %v1878_v51, %s2067_s14 }
 0x763   :  { %v1880_v2 = vpop.eup %1879 }
 0x764   :  { %v772_v4 = vadd.f32 1.0, %v1880_v2 }
 0x766   :  { %1881 = vrcp.f32 %v772_v4 }
 0x773   :  { %v1882_v5 = vpop.eup %1881 }
 0x774   :  { %v787_v8 = vsub.f32 1.0, %v1882_v5  ;;  %v793_v38 = vmul.f32 %v1882_v5, %v2389_v0 }
 0x7b0   :  { %v748_v57 = vpop.permute.xlu0 %747 }
 0x7b1   :  { %v750_v48 = vmul.f32 %v748_v57, %v745_v52 }
 0x7b3   :  { %v2429_v60 = vadd.f32 %v751_v58, %v750_v48 }
 0x7b5   :  { %796 = vrot.lane.b32.xlu1 %v2429_v60, %s2067_s14 }
 0x7d0   :  { %v790_v54 = vpop.permute.xlu0 %789 }
 0x7d1   :  { %v792_v12 = vmul.f32 %v790_v54, %v787_v8 }
 0x7d3   :  { %v2435_v13 = vadd.f32 %v793_v38, %v792_v12 }
 0x827   :  { %v2437_v16 = vpop.permute.xlu1 %796 }
 0x828   :  { %v799_v20 = vsel %vm106_vm0, %v2437_v16, %v2435_v13 }
 0x829   :  { %1708 = vmatmul.mubr.msk.f32.vlgmr.msra.gmra.mxu1 %vm352_vm1, %v799_v20 }
 0x82a   :  { %1116 = vmatpush1.msra.mxu1 %v2159_v7  ;;  %1163 = vmatprep.mubr.f32.mxu1 %v2065_v33 }
 0x82b   :  { %1117 = vmatprep.subr.mxu1 %v2166_v9 }
 0x82c   :  { %1118 = vmatpush1.msra.mxu1 %v2171_v10 }
 0x82d   :  { %1119 = vmatprep.subr.mxu1 %v2184_v14 }
 0x82e   :  { %1120 = vmatpush1.msra.mxu1 %v2187_v15 }
 0x82f   :  { %1121 = vmatprep.subr.mxu1 %v2195_v17 }
 0x830   :  { %1122 = vmatpush1.msra.mxu1 %v2199_v18 }
 0x831   :  { %1123 = vmatprep.subr.mxu1 %v2206_v21 }
 0x832   :  { %1124 = vmatpush1.msra.mxu1 %v2209_v22 }
 0x833   :  { %1125 = vmatprep.subr.mxu1 %v2215_v24 }
 0x834   :  { %1126 = vmatpush1.msra.mxu1 %v2219_v25 }
 0x835   :  { %1127 = vmatprep.subr.mxu1 %v2226_v28 }
 0x836   :  { %1128 = vmatpush1.msra.mxu1 %v2229_v29 }
 0x837   :  { %1129 = vmatprep.subr.mxu1 %v2232_v30 }
 0x838   :  { %1130 = vmatpush1.msra.mxu1 %v2236_v31 }
 0x839   :  { %1411 = vmatprep.subr.mxu1 %v2157_v6 }
 0x8e9   :  { %v869_v1 = vpop.f32.mrf.mxu1 }
 0x8ea   :  { %v881_v23 = vadd.f32 %v869_v1, %v2303_v49  ;;  %902 = vrot.lane.b32.xlu1 %v869_v1, %s2066_s3  ;;  %v874_v35 = vadd.f32 %v869_v1, %v2293_v39 }
 0x8eb   :  { %v871_v32 = vpop.f32.mrf.mxu1 }
 0x8ec   :  { %883 = vrot.lane.b32.xlu0 %v881_v23, %s2064_s26  ;;  %v923_v19 = vadd.f32 %v2176_v11, %v871_v32  ;;  %v1709_v36 = vmul.f32 -1.442695, %v874_v35 }
 0x8ee   :  { %1883 = vpow2.f32 %v1709_v36 }
 0x8f0   :  { %925 = vrot.lane.b32.xlu0 %v923_v19, %s2067_s14 }
 0x8fb   :  { %v1884_v34 = vpop.eup %1883 }
 0x8fc   :  { %v878_v37 = vadd.f32 1.0, %v1884_v34 }
 0x8fe   :  { %1885 = vrcp.f32 %v878_v37 }
 0x90b   :  { %v1886_v42 = vpop.eup %1885 }
 0x90c   :  { %v893_v8 = vsub.f32 1.0, %v1886_v42  ;;  %v899_v38 = vmul.f32 %v1886_v42, %v2429_v60 }
 0x95c   :  { %v903_v6 = vpop.permute.xlu1 %902 }
 0x95d   :  { %v905_v40 = vadd.f32 %v903_v6, %v2333_v3 }
 0x95e   :  { %v884_v44 = vpop.permute.xlu0 %883 }
 0x95f   :  { %v1710_v46 = vmul.f32 -1.442695, %v905_v40  ;;  %v886_v51 = vmul.f32 %v1886_v42, %v884_v44 }
 0x961   :  { %1887 = vpow2.f32 %v1710_v46  ;;  %888 = vrot.lane.b32.xlu1 %v886_v51, %s2064_s26 }
 0x962   :  { %v926_v48 = vpop.permute.xlu0 %925 }
 0x96e   :  { %v1888_v52 = vpop.eup %1887 }
 0x96f   :  { %v909_v57 = vadd.f32 1.0, %v1888_v52 }
 0x971   :  { %1889 = vrcp.f32 %v909_v57 }
 0x97e   :  { %v1890_v58 = vpop.eup %1889 }
 0x97f   :  { %v928_v41 = vmul.f32 %v1890_v58, %v926_v48 }
 0x981   :  { %930 = vrot.lane.b32.xlu0 %v928_v41, %s2064_s26 }
 0x985   :  { %913 = vrot.lane.b32.xlu0 %v871_v32, %s2066_s3 }
 0x9d3   :  { %v889_v62 = vpop.permute.xlu1 %888 }
 0x9d4   :  { %v891_v55 = vadd.f32 %v889_v62, %v2293_v39 }
 0x9d6   :  { %1891 = vtanh.f32 %v891_v55 }
 0x9e3   :  { %v1892_v2 = vpop.eup %1891 }
 0x9e4   :  { %895 = vrot.lane.b32.xlu1 %v1892_v2, %s2067_s14 }
 0x9f3   :  { %v931_v4 = vpop.permute.xlu0 %930 }
 0x9f4   :  { %v933_v5 = vadd.f32 %v931_v4, %v2333_v3 }
 0x9f6   :  { %1893 = vtanh.f32 %v933_v5 }
 0x9f7   :  { %v914_v39 = vpop.permute.xlu0 %913 }
 0x9f8   :  { %v916_v23 = vadd.f32 %v914_v39, %v2333_v3 }
 0x9fa   :  { %v1711_v32 = vmul.f32 -1.442695, %v916_v23 }
 0x9fc   :  { %1895 = vpow2.f32 %v1711_v32 }
 0xa03   :  { %v1894_v54 = vpop.eup %1893 }
 0xa04   :  { %937 = vrot.lane.b32.xlu1 %v1894_v54, %s2067_s14 }
 0xa09   :  { %v1896_v19 = vpop.eup %1895 }
 0xa0a   :  { %v920_v35 = vadd.f32 1.0, %v1896_v19 }
 0xa0c   :  { %1897 = vrcp.f32 %v920_v35 }
 0xa19   :  { %v1898_v36 = vpop.eup %1897 }
 0xa1a   :  { %v935_v37 = vsub.f32 1.0, %v1898_v36  ;;  %v941_v60 = vmul.f32 %v1898_v36, %v2435_v13 }
 0xa56   :  { %v896_v12 = vpop.permute.xlu1 %895 }
 0xa57   :  { %v898_v20 = vmul.f32 %v896_v12, %v893_v8 }
 0xa59   :  { %v2475_v1 = vadd.f32 %v899_v38, %v898_v20 }
 0xa5b   :  { %944 = vrot.lane.b32.xlu0 %v2475_v1, %s2067_s14 }
 0xa76   :  { %v938_v34 = vpop.permute.xlu1 %937 }
 0xa77   :  { %v940_v6 = vmul.f32 %v938_v34, %v935_v37 }
 0xa79   :  { %v2481_v40 = vadd.f32 %v941_v60, %v940_v6 }
 0xacd   :  { %v2483_v42 = vpop.permute.xlu0 %944 }
 0xace   :  { %v947_v44 = vsel %vm106_vm0, %v2483_v42, %v2481_v40 }
 0xacf   :  { %1712 = vmatmul.mubr.msk.f32.vlgmr.msra.gmra.mxu0 %vm352_vm1, %v947_v44 }
 0xad0   :  { %1264 = vmatpush1.msra.mxu0 %v2159_v7  ;;  %1311 = vmatprep.mubr.f32.mxu0 %v2065_v33 }
 0xad1   :  { %1265 = vmatprep.subr.mxu0 %v2166_v9 }
 0xad2   :  { %1266 = vmatpush1.msra.mxu0 %v2171_v10 }
 0xad3   :  { %1267 = vmatprep.subr.mxu0 %v2184_v14 }
 0xad4   :  { %1268 = vmatpush1.msra.mxu0 %v2187_v15 }
 0xad5   :  { %1269 = vmatprep.subr.mxu0 %v2195_v17 }
 0xad6   :  { %1270 = vmatpush1.msra.mxu0 %v2199_v18 }
 0xad7   :  { %1271 = vmatprep.subr.mxu0 %v2206_v21 }
 0xad8   :  { %1272 = vmatpush1.msra.mxu0 %v2209_v22 }
 0xad9   :  { %1273 = vmatprep.subr.mxu0 %v2215_v24 }
 0xada   :  { %1274 = vmatpush1.msra.mxu0 %v2219_v25 }
 0xadb   :  { %1275 = vmatprep.subr.mxu0 %v2226_v28 }
 0xadc   :  { %1276 = vmatpush1.msra.mxu0 %v2229_v29 }
 0xadd   :  { %1277 = vmatprep.subr.mxu0 %v2232_v30 }
 0xade   :  { %1278 = vmatpush1.msra.mxu0 %v2236_v31 }
 0xadf   :  { %1803 = vmatprep.subr.mxu0 %v2065_v33 }
 0xb8f   :  { %v1017_v7 = vpop.f32.mrf.mxu0 }
 0xb90   :  { %v1029_v9 = vadd.f32 %v1017_v7, %v2303_v49  ;;  %1050 = vrot.lane.b32.xlu0 %v1017_v7, %s2066_s3  ;;  %v1022_v3 = vadd.f32 %v1017_v7, %v2299_v45 }
 0xb91   :  { %v1019_v10 = vpop.f32.mrf.mxu0 }
 0xb92   :  { %1031 = vrot.lane.b32.xlu1 %v1029_v9, %s2064_s26  ;;  %v1071_v14 = vadd.f32 %v2176_v11, %v1019_v10  ;;  %v1713_v46 = vmul.f32 -1.442695, %v1022_v3 }
 0xb94   :  { %1899 = vpow2.f32 %v1713_v46 }
 0xb96   :  { %1073 = vrot.lane.b32.xlu1 %v1071_v14, %s2067_s14 }
 0xba1   :  { %v1900_v51 = vpop.eup %1899 }
 0xba2   :  { %v1026_v52 = vadd.f32 1.0, %v1900_v51 }
 0xba4   :  { %1901 = vrcp.f32 %v1026_v52 }
 0xbb1   :  { %v1902_v48 = vpop.eup %1901 }
 0xbb2   :  { %v1041_v36 = vsub.f32 1.0, %v1902_v48 }
 0xc02   :  { %v1051_v57 = vpop.permute.xlu0 %1050 }
 0xc03   :  { %v1053_v58 = vadd.f32 %v1051_v57, %v2324_v61  ;;  %v1965_v57 = vld [vmem:[#allocation5 + $0x70] sm:$0xff] }
 0xc04   :  { %v1032_v41 = vpop.permute.xlu1 %1031 }
 0xc05   :  { %v1714_v62 = vmul.f32 -1.442695, %v1053_v58  ;;  %v1034_v55 = vmul.f32 %v1902_v48, %v1032_v41  ;;  %v1966_v58 = vld [vmem:[#allocation5 + $0x68] sm:$0xff] }
 0xc07   :  { %1903 = vpow2.f32 %v1714_v62  ;;  %1036 = vrot.lane.b32.xlu0 %v1034_v55, %s2064_s26 }
 0xc08   :  { %v1074_v5 = vpop.permute.xlu1 %1073 }
 0xc14   :  { %v1904_v11 = vpop.eup %1903 }
 0xc15   :  { %v1057_v2 = vadd.f32 1.0, %v1904_v11 }
 0xc17   :  { %1905 = vrcp.f32 %v1057_v2 }
 0xc24   :  { %v1906_v4 = vpop.eup %1905 }
 0xc25   :  { %v1076_v54 = vmul.f32 %v1906_v4, %v1074_v5 }
 0xc27   :  { %1078 = vrot.lane.b32.xlu1 %v1076_v54, %s2064_s26 }
 0xc2b   :  { %1061 = vrot.lane.b32.xlu1 %v1019_v10, %s2066_s3 }
 0xc79   :  { %v1037_v8 = vpop.permute.xlu0 %1036 }
 0xc7a   :  { %v1039_v12 = vadd.f32 %v1037_v8, %v2299_v45  ;;  %v1047_v45 = vmul.f32 %v1902_v48, %v2475_v1  ;;  %v1968_v48 = vld [vmem:[#allocation5 + $0x58] sm:$0xff] }
 0xc7c   :  { %1907 = vtanh.f32 %v1039_v12 }
 0xc89   :  { %v1908_v38 = vpop.eup %1907 }
 0xc8a   :  { %1043 = vrot.lane.b32.xlu0 %v1908_v38, %s2067_s14 }
 0xc99   :  { %v1079_v20 = vpop.permute.xlu1 %1078 }
 0xc9a   :  { %v1081_v39 = vadd.f32 %v1079_v20, %v2324_v61 }
 0xc9c   :  { %1909 = vtanh.f32 %v1081_v39 }
 0xc9d   :  { %v1062_v32 = vpop.permute.xlu1 %1061 }
 0xc9e   :  { %v1064_v19 = vadd.f32 %v1062_v32, %v2324_v61 }
 0xca0   :  { %v1715_v35 = vmul.f32 -1.442695, %v1064_v19 }
 0xca2   :  { %1911 = vpow2.f32 %v1715_v35 }
 0xca9   :  { %v1910_v23 = vpop.eup %1909 }
 0xcaa   :  { %1085 = vrot.lane.b32.xlu0 %v1910_v23, %s2067_s14 }
 0xcaf   :  { %v1912_v60 = vpop.eup %1911 }
 0xcb0   :  { %v1068_v44 = vadd.f32 1.0, %v1912_v60 }
 0xcb2   :  { %1913 = vrcp.f32 %v1068_v44 }
 0xcbf   :  { %v1914_v7 = vpop.eup %1913 }
 0xcc0   :  { %v1083_v9 = vsub.f32 1.0, %v1914_v7  ;;  %v1089_v61 = vmul.f32 %v1914_v7, %v2481_v40 }
 0xcfc   :  { %v1044_v34 = vpop.permute.xlu0 %1043 }
 0xcfd   :  { %v1046_v37 = vmul.f32 %v1044_v34, %v1041_v36 }
 0xcff   :  { %v2522_v6 = vadd.f32 %v1047_v45, %v1046_v37 }
 0xd01   :  { %1092 = vrot.lane.b32.xlu1 %v2522_v6, %s2067_s14 }
 0xd1c   :  { %v1086_v10 = vpop.permute.xlu0 %1085 }
 0xd1d   :  { %v1088_v14 = vmul.f32 %v1086_v10, %v1083_v9 }
 0xd1f   :  { %v2527_v3 = vadd.f32 %v1089_v61, %v1088_v14 }
 0xd21   :  { %v1542_v1 = vsel %vm106_vm0, %v2483_v42, %v2527_v3  ;;  %v1967_v42 = vld [vmem:[#allocation5 + $0x60] sm:$0xff] }
 0xd22   :  { %1550 = vst.msk [vmem:[#allocation7 + $0x18] sm:$0xff] %vm352_vm1, %v1542_v1 }
 0xd73   :  { %v1093_v46 = vpop.permute.xlu1 %1092 }
 0xd74   :  { %v1095_v51 = vsel %vm106_vm0, %v1093_v46, %v2527_v3  ;;  %v1543_v52 = vsel %vm106_vm0, %v1093_v46, %v2481_v40 }
 0xd75   :  { %1551 = vst.msk [vmem:[#allocation7 + $0x20] sm:$0xff] %vm352_vm1, %v1543_v52  ;;  %1716 = vmatmul.mubr.msk.f32.vlgmr.msra.gmra.mxu1 %vm352_vm1, %v1095_v51 }
 0xd76   :  { %1412 = vmatpush1.msra.mxu1 %v1965_v57  ;;  %1459 = vmatprep.mubr.f32.mxu1 %v2065_v33 }
 0xd77   :  { %1413 = vmatprep.subr.mxu1 %v1966_v58 }
 0xd78   :  { %1414 = vmatpush1.msra.mxu1 %v1967_v42 }
 0xd79   :  { %1415 = vmatprep.subr.mxu1 %v1968_v48 }
 0xd7a   :  { %1416 = vmatpush1.msra.mxu1 %v2187_v15 }
 0xd7b   :  { %1417 = vmatprep.subr.mxu1 %v2195_v17 }
 0xd7c   :  { %1418 = vmatpush1.msra.mxu1 %v2199_v18 }
 0xd7d   :  { %1419 = vmatprep.subr.mxu1 %v2206_v21  ;;  %v2557_v21 = vld [vmem:[%s2699_s6] ss:$0 sm:$0xff] }
 0xd7e   :  { %1420 = vmatpush1.msra.mxu1 %v2209_v22 }
 0xd7f   :  { %1421 = vmatprep.subr.mxu1 %v2215_v24 }
 0xd80   :  { %1422 = vmatpush1.msra.mxu1 %v2219_v25 }
 0xd81   :  { %1423 = vmatprep.subr.mxu1 %v2226_v28 }
 0xd82   :  { %1424 = vmatpush1.msra.mxu1 %v2229_v29 }
 0xd83   :  { %1425 = vmatprep.subr.mxu1 %v2232_v30 }
 0xd84   :  { %1426 = vmatpush1.msra.mxu1 %v2236_v31 }
 0xe35   :  { %v1165_v15 = vpop.f32.mrf.mxu1 }
 0xe36   :  { %v1177_v17 = vadd.f32 %v1165_v15, %v2303_v49  ;;  %1198 = vrot.lane.b32.xlu1 %v1165_v15, %s2066_s3  ;;  %v1170_v24 = vadd.f32 %v1165_v15, %v2297_v43 }
 0xe37   :  { %v1167_v18 = vpop.f32.mrf.mxu1 }
 0xe38   :  { %1179 = vrot.lane.b32.xlu0 %v1177_v17, %s2064_s26  ;;  %v1219_v22 = vadd.f32 %v2557_v21, %v1167_v18  ;;  %v1717_v25 = vmul.f32 -1.442695, %v1170_v24 }
 0xe3a   :  { %1915 = vpow2.f32 %v1717_v25 }
 0xe3c   :  { %1221 = vrot.lane.b32.xlu0 %v1219_v22, %s2067_s14 }
 0xe47   :  { %v1916_v28 = vpop.eup %1915 }
 0xe48   :  { %v1174_v29 = vadd.f32 1.0, %v1916_v28 }
 0xe4a   :  { %1917 = vrcp.f32 %v1174_v29 }
 0xe57   :  { %v1918_v40 = vpop.eup %1917 }
 0xe58   :  { %v1189_v36 = vsub.f32 1.0, %v1918_v40 }
 0xea8   :  { %v1199_v30 = vpop.permute.xlu1 %1198 }
 0xea9   :  { %v1201_v31 = vadd.f32 %v1199_v30, %v2327_v63 }
 0xeaa   :  { %v1180_v41 = vpop.permute.xlu0 %1179 }
 0xeab   :  { %v1718_v62 = vmul.f32 -1.442695, %v1201_v31  ;;  %v1182_v55 = vmul.f32 %v1918_v40, %v1180_v41 }
 0xead   :  { %1919 = vpow2.f32 %v1718_v62  ;;  %1184 = vrot.lane.b32.xlu1 %v1182_v55, %s2064_s26 }
 0xeae   :  { %v1222_v5 = vpop.permute.xlu0 %1221 }
 0xeba   :  { %v1920_v11 = vpop.eup %1919 }
 0xebb   :  { %v1205_v2 = vadd.f32 1.0, %v1920_v11 }
 0xebd   :  { %1921 = vrcp.f32 %v1205_v2 }
 0xeca   :  { %v1922_v4 = vpop.eup %1921 }
 0xecb   :  { %v1224_v54 = vmul.f32 %v1922_v4, %v1222_v5 }
 0xecd   :  { %1226 = vrot.lane.b32.xlu0 %v1224_v54, %s2064_s26 }
 0xed1   :  { %1209 = vrot.lane.b32.xlu0 %v1167_v18, %s2066_s3 }
 0xf1f   :  { %v1185_v8 = vpop.permute.xlu1 %1184 }
 0xf20   :  { %v1187_v12 = vadd.f32 %v1185_v8, %v2297_v43  ;;  %v1195_v43 = vmul.f32 %v1918_v40, %v2522_v6 }
 0xf22   :  { %1923 = vtanh.f32 %v1187_v12 }
 0xf2f   :  { %v1924_v38 = vpop.eup %1923 }
 0xf30   :  { %1191 = vrot.lane.b32.xlu1 %v1924_v38, %s2067_s14 }
 0xf3f   :  { %v1227_v20 = vpop.permute.xlu0 %1226 }
 0xf40   :  { %v1229_v39 = vadd.f32 %v1227_v20, %v2327_v63 }
 0xf42   :  { %1925 = vtanh.f32 %v1229_v39 }
 0xf43   :  { %v1210_v32 = vpop.permute.xlu0 %1209 }
 0xf44   :  { %v1212_v19 = vadd.f32 %v1210_v32, %v2327_v63 }
 0xf46   :  { %v1719_v35 = vmul.f32 -1.442695, %v1212_v19 }
 0xf48   :  { %1927 = vpow2.f32 %v1719_v35 }
 0xf4f   :  { %v1926_v23 = vpop.eup %1925 }
 0xf50   :  { %1233 = vrot.lane.b32.xlu1 %v1926_v23, %s2067_s14 }
 0xf55   :  { %v1928_v60 = vpop.eup %1927 }
 0xf56   :  { %v1216_v44 = vadd.f32 1.0, %v1928_v60 }
 0xf58   :  { %1929 = vrcp.f32 %v1216_v44 }
 0xf65   :  { %v1930_v7 = vpop.eup %1929 }
 0xf66   :  { %v1231_v9 = vsub.f32 1.0, %v1930_v7  ;;  %v1237_v63 = vmul.f32 %v1930_v7, %v2527_v3 }
 0xfa2   :  { %v1192_v34 = vpop.permute.xlu1 %1191 }
 0xfa3   :  { %v1194_v45 = vmul.f32 %v1192_v34, %v1189_v36 }
 0xfa5   :  { %v2572_v37 = vadd.f32 %v1195_v43, %v1194_v45 }
 0xfa7   :  { %1240 = vrot.lane.b32.xlu0 %v2572_v37, %s2067_s14 }
 0xfc2   :  { %v1234_v10 = vpop.permute.xlu1 %1233 }
 0xfc3   :  { %v1236_v14 = vmul.f32 %v1234_v10, %v1231_v9 }
 0xfc5   :  { %v2577_v61 = vadd.f32 %v1237_v63, %v1236_v14 }
 0xfc7   :  { %v1541_v6 = vsel %vm106_vm0, %v2437_v16, %v2577_v61 }
 0xfc8   :  { %1549 = vst.msk [vmem:[#allocation7 + $0x10] sm:$0xff] %vm352_vm1, %v1541_v6 }
0x1019   :  { %v1241_v1 = vpop.permute.xlu0 %1240 }
0x101a   :  { %v1243_v46 = vsel %vm106_vm0, %v1241_v1, %v2577_v61  ;;  %v1544_v51 = vsel %vm106_vm0, %v1241_v1, %v2435_v13 }
0x101b   :  { %1552 = vst.msk [vmem:[#allocation7 + $0x28] sm:$0xff] %vm352_vm1, %v1544_v51  ;;  %1720 = vmatmul.mubr.msk.f32.vlgmr.msra.gmra.mxu0 %vm352_vm1, %v1243_v46 }
0x101c   :  { %1819 = vmatprep.mubr.msk.f32.mxu0 %vm2068_vm2, %v2065_v33 }
0x10db   :  { %v1313_v3 = vpop.f32.mrf.mxu0 }
0x10dc   :  { %v1325_v52 = vadd.f32 %v1313_v3, %v2303_v49  ;;  %1346 = vrot.lane.b32.xlu0 %v1313_v3, %s2066_s3  ;;  %v1318_v58 = vadd.f32 %v1313_v3, %v2305_v50 }
0x10dd   :  { %v1315_v57 = vpop.f32.mrf.mxu0 }
0x10de   :  { %1327 = vrot.lane.b32.xlu1 %v1325_v52, %s2064_s26  ;;  %v1367_v16 = vadd.f32 %v2557_v21, %v1315_v57  ;;  %v1721_v42 = vmul.f32 -1.442695, %v1318_v58 }
0x10e0   :  { %1931 = vpow2.f32 %v1721_v42 }
0x10e2   :  { %1369 = vrot.lane.b32.xlu1 %v1367_v16, %s2067_s14 }
0x10ed   :  { %v1932_v13 = vpop.eup %1931 }
0x10ee   :  { %v1322_v48 = vadd.f32 1.0, %v1932_v13 }
0x10f0   :  { %1933 = vrcp.f32 %v1322_v48 }
0x10fd   :  { %v1934_v18 = vpop.eup %1933 }
0x10fe   :  { %v1337_v12 = vsub.f32 1.0, %v1934_v18 }
0x114e   :  { %v1347_v15 = vpop.permute.xlu0 %1346 }
0x114f   :  { %v1349_v17 = vadd.f32 %v1347_v15, %v2315_v56 }
0x1150   :  { %v1328_v22 = vpop.permute.xlu1 %1327 }
0x1151   :  { %v1722_v24 = vmul.f32 -1.442695, %v1349_v17  ;;  %v1330_v25 = vmul.f32 %v1934_v18, %v1328_v22  ;;  %v1562_v22 = vld [vmem:[%s2700_s7 + $0x30] sm:$0xff] }
0x1153   :  { %1935 = vpow2.f32 %v1722_v24  ;;  %1332 = vrot.lane.b32.xlu0 %v1330_v25, %s2064_s26  ;;  %v1560_v24 = vld [vmem:[%s2700_s7 + $0x20] sm:$0xff]  ;;  %v1559_v25 = vld [vmem:[%s2700_s7 + $0x18] sm:$0xff] }
0x1154   :  { %v1370_v31 = vpop.permute.xlu1 %1369 }
0x1160   :  { %v1936_v28 = vpop.eup %1935 }
0x1161   :  { %v1353_v29 = vadd.f32 1.0, %v1936_v28 }
0x1163   :  { %1937 = vrcp.f32 %v1353_v29  ;;  %v1558_v29 = vld [vmem:[%s2700_s7 + $0x10] sm:$0xff] }
0x1170   :  { %v1938_v30 = vpop.eup %1937 }
0x1171   :  { %v1372_v40 = vmul.f32 %v1938_v30, %v1370_v31  ;;  %v1557_v30 = vld [vmem:[%s2700_s7 + $0x8] sm:$0xff] }
0x1173   :  { %1374 = vrot.lane.b32.xlu1 %v1372_v40, %s2064_s26 }
0x1177   :  { %1357 = vrot.lane.b32.xlu1 %v1315_v57, %s2066_s3 }
0x11c5   :  { %v1333_v41 = vpop.permute.xlu0 %1332 }
0x11c6   :  { %v1335_v62 = vadd.f32 %v1333_v41, %v2305_v50  ;;  %v1343_v50 = vmul.f32 %v1934_v18, %v2572_v37  ;;  %v1563_v18 = vld [vmem:[%s2700_s7 + $0x38] sm:$0xff] }
0x11c7   :  { %1804 = vmatpush3.msra.mxu0 %v1563_v18 }
0x11c8   :  { %1939 = vtanh.f32 %v1335_v62  ;;  %1805 = vmatprep.subr.mxu0 %v2065_v33  ;;  %v1556_v62 = vld [vmem:[%s2700_s7] sm:$0xff] }
0x11c9   :  { %1806 = vmatpush3.msra.mxu0 %v1562_v22 }
0x11ca   :  { %1807 = vmatprep.subr.mxu0 %v2065_v33 }
0x11d5   :  { %v1940_v55 = vpop.eup %1939 }
0x11d6   :  { %1339 = vrot.lane.b32.xlu0 %v1940_v55, %s2067_s14 }
0x11e5   :  { %v1375_v11 = vpop.permute.xlu1 %1374 }
0x11e6   :  { %v1377_v2 = vadd.f32 %v1375_v11, %v2315_v56 }
0x11e8   :  { %1941 = vtanh.f32 %v1377_v2 }
0x11e9   :  { %v1358_v5 = vpop.permute.xlu1 %1357 }
0x11ea   :  { %v1360_v54 = vadd.f32 %v1358_v5, %v2315_v56 }
0x11ec   :  { %v1723_v8 = vmul.f32 -1.442695, %v1360_v54 }
0x11ee   :  { %1943 = vpow2.f32 %v1723_v8 }
0x11f5   :  { %v1942_v4 = vpop.eup %1941 }
0x11f6   :  { %1381 = vrot.lane.b32.xlu0 %v1942_v4, %s2067_s14 }
0x11fb   :  { %v1944_v23 = vpop.eup %1943 }
0x11fc   :  { %v1364_v32 = vadd.f32 1.0, %v1944_v23 }
0x11fe   :  { %1945 = vrcp.f32 %v1364_v32 }
0x120b   :  { %v1946_v19 = vpop.eup %1945 }
0x120c   :  { %v1379_v35 = vsub.f32 1.0, %v1946_v19  ;;  %v1385_v56 = vmul.f32 %v1946_v19, %v2577_v61 }
0x1248   :  { %v1340_v38 = vpop.permute.xlu0 %1339 }
0x1249   :  { %v1342_v20 = vmul.f32 %v1340_v38, %v1337_v12 }
0x124b   :  { %v2605_v39 = vadd.f32 %v1343_v50, %v1342_v20 }
0x124d   :  { %1388 = vrot.lane.b32.xlu1 %v2605_v39, %s2067_s14 }
0x1268   :  { %v1382_v36 = vpop.permute.xlu0 %1381 }
0x1269   :  { %v1384_v34 = vmul.f32 %v1382_v36, %v1379_v35 }
0x126b   :  { %v2610_v43 = vadd.f32 %v1385_v56, %v1384_v34 }
0x126d   :  { %v1540_v45 = vsel %vm106_vm0, %v2391_v53, %v2610_v43 }
0x126e   :  { %1548 = vst.msk [vmem:[#allocation7 + $0x8] sm:$0xff] %vm352_vm1, %v1540_v45 }
0x12bf   :  { %v1389_v37 = vpop.permute.xlu1 %1388 }
0x12c0   :  { %v1391_v60 = vsel %vm106_vm0, %v1389_v37, %v2610_v43  ;;  %v1545_v44 = vsel %vm106_vm0, %v1389_v37, %v2389_v0 }
0x12c1   :  { %1553 = vst.msk [vmem:[#allocation7 + $0x30] sm:$0xff] %vm352_vm1, %v1545_v44  ;;  %1724 = vmatmul.mubr.msk.f32.vlgmr.msra.gmra.mxu1 %vm352_vm1, %v1391_v60 }
0x1381   :  { %v1461_v7 = vpop.f32.mrf.mxu1 }
0x1382   :  { %v1473_v9 = vadd.f32 %v1461_v7, %v2303_v49  ;;  %1494 = vrot.lane.b32.xlu1 %v1461_v7, %s2066_s3  ;;  %v1466_v14 = vadd.f32 %v1461_v7, %v2301_v47 }
0x1383   :  { %v1463_v10 = vpop.f32.mrf.mxu1 }
0x1384   :  { %1475 = vrot.lane.b32.xlu0 %v1473_v9, %s2064_s26  ;;  %v1515_v53 = vadd.f32 %v2557_v21, %v1463_v10  ;;  %v1725_v63 = vmul.f32 -1.442695, %v1466_v14 }
0x1386   :  { %1947 = vpow2.f32 %v1725_v63 }
0x1388   :  { %1517 = vrot.lane.b32.xlu0 %v1515_v53, %s2067_s14 }
0x1393   :  { %v1948_v0 = vpop.eup %1947 }
0x1394   :  { %v1470_v61 = vadd.f32 1.0, %v1948_v0 }
0x1396   :  { %1949 = vrcp.f32 %v1470_v61 }
0x13a3   :  { %v1950_v49 = vpop.eup %1949 }
0x13a4   :  { %v1485_v55 = vsub.f32 1.0, %v1950_v49  ;;  %v1491_v2 = vmul.f32 %v1950_v49, %v2605_v39 }
0x13f4   :  { %v1495_v6 = vpop.permute.xlu1 %1494 }
0x13f5   :  { %v1497_v1 = vadd.f32 %v1495_v6, %v2320_v59 }
0x13f6   :  { %v1476_v46 = vpop.permute.xlu0 %1475 }
0x13f7   :  { %v1726_v51 = vmul.f32 -1.442695, %v1497_v1  ;;  %v1478_v3 = vmul.f32 %v1950_v49, %v1476_v46 }
0x13f9   :  { %1951 = vpow2.f32 %v1726_v51  ;;  %1480 = vrot.lane.b32.xlu1 %v1478_v3, %s2064_s26 }
0x13fa   :  { %v1518_v16 = vpop.permute.xlu0 %1517 }
0x1406   :  { %v1952_v21 = vpop.eup %1951 }
0x1407   :  { %v1501_v52 = vadd.f32 1.0, %v1952_v21 }
0x1409   :  { %1953 = vrcp.f32 %v1501_v52 }
0x1416   :  { %v1954_v57 = vpop.eup %1953 }
0x1417   :  { %v1520_v58 = vmul.f32 %v1954_v57, %v1518_v16 }
0x1419   :  { %1522 = vrot.lane.b32.xlu0 %v1520_v58, %s2064_s26 }
0x141d   :  { %1505 = vrot.lane.b32.xlu0 %v1463_v10, %s2066_s3 }
0x146b   :  { %v1481_v42 = vpop.permute.xlu1 %1480 }
0x146c   :  { %v1483_v13 = vadd.f32 %v1481_v42, %v2301_v47  ;;  %v1561_v47 = vld [vmem:[%s2700_s7 + $0x28] sm:$0xff]  ;;  %s2069_s7 = smov [#allocation7]  }
0x146d   :  { %1808 = vmatpush3.msra.mxu0 %v1561_v47  ;;  %s1651_s11 = sshll.u32 %s2069_s7, 4  ;;  %s1652_s11 = int_to_ptr.vmem [resolvable:$true] %s1651_s11 }
0x146e   :  { %1955 = vtanh.f32 %v1483_v13  ;;  %1809 = vmatprep.subr.mxu0 %v2065_v33  ;;  %s2010_s0 = scalar_lea.vmem %s1652_s11, 1024  ;;  %p2015_p11 = scmp.lt.s32.totalorder %s1652_s11, %s1652_s11 }
0x146f   :  { %1810 = vmatpush3.msra.mxu0 %v1560_v24  ;;  %p2011_p10 = scmp.ne.s32.totalorder %s1652_s11, %s2010_s0  ;;  %p2016_p12 = scmp.lt.s32.totalorder %s2010_s0, %s2010_s0 }
0x1470   :  { %1811 = vmatprep.subr.mxu0 %v2065_v33 }
0x1471   :  { %1812 = vmatpush3.msra.mxu0 %v1559_v25  ;;  %p2017_p13 = por %p2016_p12, %p2015_p11 }
0x1472   :  { %1813 = vmatprep.subr.mxu0 %v2065_v33 }
0x1473   :  { %1814 = vmatpush3.msra.mxu0 %v1558_v29  ;;  %p2018_p0 = pnand %p2017_p13, %p2011_p10 }
0x1474   :  { %1815 = vmatprep.subr.mxu0 %v2065_v33 }
0x1475   :  { %1816 = vmatpush3.msra.mxu0 %v1557_v30 }
0x1476   :  { %1817 = vmatprep.subr.mxu0 %v2065_v33 }
0x1477   :  { %1818 = vmatpush3.msra.mxu0 %v1556_v62 }
0x147b   :  { %v1956_v48 = vpop.eup %1955 }
0x147c   :  { %1487 = vrot.lane.b32.xlu1 %v1956_v48, %s2067_s14 }
0x148b   :  { %v1523_v15 = vpop.permute.xlu0 %1522 }
0x148c   :  { %v1525_v17 = vadd.f32 %v1523_v15, %v2320_v59 }
0x148e   :  { %1957 = vtanh.f32 %v1525_v17 }
0x148f   :  { %v1506_v31 = vpop.permute.xlu0 %1505 }
0x1490   :  { %v1508_v40 = vadd.f32 %v1506_v31, %v2320_v59 }
0x1492   :  { %v1727_v41 = vmul.f32 -1.442695, %v1508_v40 }
0x1494   :  { %1959 = vpow2.f32 %v1727_v41 }
0x149b   :  { %v1958_v28 = vpop.eup %1957 }
0x149c   :  { %1529 = vrot.lane.b32.xlu1 %v1958_v28, %s2067_s14 }
0x14a1   :  { %v1960_v54 = vpop.eup %1959 }
0x14a2   :  { %v1512_v59 = vadd.f32 1.0, %v1960_v54 }
0x14a4   :  { %1961 = vrcp.f32 %v1512_v59 }
0x14b1   :  { %v1962_v8 = vpop.eup %1961 }
0x14b2   :  { %v1527_v12 = vsub.f32 1.0, %v1962_v8  ;;  %v1533_v20 = vmul.f32 %v1962_v8, %v2610_v43 }
0x14ee   :  { %v1488_v11 = vpop.permute.xlu1 %1487 }
0x14ef   :  { %v1490_v4 = vmul.f32 %v1488_v11, %v1485_v55 }
0x14f1   :  { %v1492_v5 = vadd.f32 %v1491_v2, %v1490_v4 }
0x14f3   :  { %1536 = vrot.lane.b32.xlu0 %v1492_v5, %s2067_s14 }
0x150e   :  { %v1530_v38 = vpop.permute.xlu1 %1529 }
0x150f   :  { %v1532_v50 = vmul.f32 %v1530_v38, %v1527_v12 }
0x1511   :  { %v1534_v23 = vadd.f32 %v1533_v20, %v1532_v50 }
0x1513   :  { %v1539_v33 = vsel %vm106_vm0, %v2347_v26, %v1534_v23 }
0x1514   :  { %1547 = vst.msk [vmem:[#allocation7] sm:$0xff] %vm352_vm1, %v1539_v33 }
0x1565   :  { %v1537_v39 = vpop.permute.xlu0 %1536 }
0x1566   :  { %v1546_v32 = vsel %vm106_vm0, %v1537_v39, %v2345_v27  ;;  %v1555_v19 = vsel %vm106_vm0, %v1537_v39, %v1534_v23 }
0x1567   :  { %1554 = vst.msk [vmem:[#allocation7 + $0x38] sm:$0xff] %vm352_vm1, %v1546_v32  ;;  %1820 = vmatmul.mubr.msk.f32.vlgmr.msra.gmra.mxu0 %vm352_vm1, %v1555_v19 }
0x1568   :  { %2021 = shalt.err (!%p2018_p0)
}
0x1569   :  { %1657 = dma.vmem_to_hbm [thread:$0]  %s1652_s11, 1024, %s2702_s9, [#allocation4], %s2059_s16, %s2059_s16, %s2060_s17  }
0x156a   :  { %v1728_v27 = vld [vmem:[%s2701_s8] ss:$0 sm:$0xff]  ;;  %s2070_s14 = smov [#allocation8]  }
0x156b   :  { %s1664_s4 = sshll.u32 %s2070_s14, 4  ;;  %s1665_s4 = int_to_ptr.vmem [resolvable:$true] %s1664_s4 }
0x156c   :  { %s2030_s15 = scalar_lea.vmem %s1665_s4, 128  ;;  %p2035_p2 = scmp.lt.s32.totalorder %s1665_s4, %s1665_s4 }
0x156d   :  { %p2031_p1 = scmp.ne.s32.totalorder %s1665_s4, %s2030_s15  ;;  %p2036_p3 = scmp.lt.s32.totalorder %s2030_s15, %s2030_s15 }
0x156f   :  { %p2037_p4 = por %p2036_p3, %p2035_p2 }
0x1571   :  { %p2038_p5 = pnand %p2037_p4, %p2031_p1 }
0x1627   :  { %v1640_v26 = vpop.f32.mrf.mxu0 }
0x1628   :  { %v1641_v35 = vadd.f32 %v1728_v27, %v1640_v26 }
0x1629   :  { %v1821_v36 = vpop.f32.mrf.mxu0 }
0x162a   :  { %1963 = vtanh.f32 %v1641_v35 }
0x1637   :  { %v1964_v34 = vpop.eup %1963 }
0x1638   :  { %1645 = vst.msk [vmem:[#allocation8] sm:$0xff] %vm106_vm0, %v1964_v34 }
0x1639   :  { %2041 = shalt.err (!%p2038_p5)
}
0x163a   :  { %1667 = dma.vmem_to_hbm [thread:$0]  %s1665_s4, 128, %s2703_s10, [#allocation9]  }
0x163b   :  { %2054 = dma.done.wait [#allocation4], 1024  }
0x163c   :  { %2055 = vsyncadd [#allocation4], 4294966272 }
0x163d   :  { %2056 = dma.done.wait [#allocation9], 128  }
0x163e   :  { %2057 = vsyncadd [#allocation9], 4294967168 }
0x163f   :  { %1674 = vsyncpa [#allocation3], 1 }
0x1640   :  { %1675 = vsyncpa [#allocation6], 1 }
0x1641   :  { %1676 = vsyncpa [#allocation4], 1 }
0x1642   :  { %1677 = vsyncpa [#allocation9], 1 }

</bundles_post_ra>
